<compile_context>
chip_gen: v6e
topology: v6e:2x2x1
jax: 0.10.0
libtpu: 0.0.40
codegen_flags: <defaults>
</compile_context>

<pallas_src>
import jax
import jax.numpy as jnp
from jax.experimental import pallas as pl
from jax.experimental.pallas import tpu as pltpu


def upsample_block_kernel(x_ref, scale_ref, bias_ref, w_ref, o_ref):
    # x_ref:     (1, Cin, TH, W)      input tile (NCHW), f32 or bf16
    # scale_ref: (Cin, 1, 1)          folded BN scale  = gamma / sqrt(var + eps)   (f32)
    # bias_ref:  (Cin, 1, 1)          folded BN bias   = beta - mean * scale       (f32)
    # w_ref:     (Cin, Cout, 1, 1)    1x1 ConvTranspose2d weight (PyTorch layout)  (f32)
    # o_ref:     (1, Cout, 2*TH, 2*W) output tile (NCHW)
    cin = x_ref.shape[1]
    cout = o_ref.shape[1]

    def dup2_rows(m):
        # Nearest-neighbour x2 duplication along the sublane (row) axis via
        # broadcast + reshape (no lane-axis data movement, no extra intermediates).
        r, c = m.shape
        return jnp.broadcast_to(m[:, None, :], (r, 2, c)).reshape(2 * r, c)

    # BatchNorm (eval, folded) + ReLU.  Spatial (TH, W) sits on (sublane, lane),
    # so this is dense elementwise VPU work; accumulation stays in f32.
    x = x_ref[0].astype(jnp.float32)                          # (Cin, TH, W)
    y = jnp.maximum(x * scale_ref[...] + bias_ref[...], 0.0)  # (Cin, TH, W)

    for co in range(cout):
        # 1x1 ConvTranspose2d == weighted sum over input channels (VPU, no MXU).
        acc = y[0] * w_ref[0, co]                             # (TH, W) * (1, 1)
        for c in range(1, cin):
            acc = acc + y[c] * w_ref[c, co]

        # Nearest x2 upsample:
        #   width  (lane axis):   transpose -> duplicate rows -> transpose back
        #   height (sublane axis): duplicate rows
        cols2 = dup2_rows(acc.T)                              # (2W, TH)
        up = dup2_rows(cols2.T)                               # (2TH, 2W)
        o_ref[0, co] = up.astype(o_ref.dtype)


def _pick_tile_h(H, W, Cin, Cout, itemsize, max_block_bytes):
    """Largest H-tile whose (input + 4x-upsampled output) block fits the VMEM budget.

    tile_h must divide H and (unless it equals H) be a multiple of 8 so the block's
    second-minor dim stays sublane aligned.
    """
    def block_bytes(th):
        return (Cin * th * W + Cout * (2 * th) * (2 * W)) * itemsize

    candidates = [th for th in range(1, H + 1)
                  if H % th == 0 and (th == H or th % 8 == 0)]
    fitting = [th for th in candidates if block_bytes(th) <= max_block_bytes]
    if fitting:
        return max(fitting)
    return min(candidates)   # fall back to the smallest legal tile


def upsample_block(x_nchw, gamma, beta, run_mean, run_var, conv_w,
                   *, eps=1e-5, max_block_bytes=3 << 20):
    """x_nchw: (N, Cin, H, W); conv_w: (Cin, Cout, 1, 1) (PyTorch ConvTranspose2d layout).

    Returns (N, Cout, 2H, 2W) in the input dtype (f32 or bf16), matching the PyTorch
    module's eval-mode forward.
    """
    N, Cin, H, W = x_nchw.shape
    Cout = conv_w.shape[1]
    out_dtype = x_nchw.dtype
    itemsize = jnp.dtype(out_dtype).itemsize

    # Fold BatchNorm (eval) into a per-channel scale/bias.
    inv_std = 1.0 / jnp.sqrt(run_var.astype(jnp.float32) + eps)
    scale = (gamma.astype(jnp.float32) * inv_std).reshape(Cin, 1, 1)
    bias = (beta.astype(jnp.float32)
            - run_mean.astype(jnp.float32) * gamma.astype(jnp.float32) * inv_std
            ).reshape(Cin, 1, 1)
    w = conv_w.astype(jnp.float32)                            # (Cin, Cout, 1, 1)

    tile_h = _pick_tile_h(H, W, Cin, Cout, itemsize, max_block_bytes)
    grid = (N, H // tile_h)

    # Bandwidth-dominated op: flops = conv MACs, bytes = input + params + 4x output.
    out_bytes = N * Cout * (2 * H) * (2 * W) * itemsize
    in_bytes = N * Cin * H * W * itemsize
    param_bytes = (scale.size + bias.size + w.size) * 4
    cost = pl.CostEstimate(flops=2 * N * H * W * Cin * Cout,
                           transcendentals=0,
                           bytes_accessed=int(in_bytes + out_bytes + param_bytes))

    out = pl.pallas_call(
        upsample_block_kernel,
        out_shape=jax.ShapeDtypeStruct((N, Cout, 2 * H, 2 * W), out_dtype),
        grid=grid,
        in_specs=[
            pl.BlockSpec((1, Cin, tile_h, W), lambda n, h: (n, 0, h, 0)),
            pl.BlockSpec((Cin, 1, 1), lambda n, h: (0, 0, 0)),
            pl.BlockSpec((Cin, 1, 1), lambda n, h: (0, 0, 0)),
            pl.BlockSpec((Cin, Cout, 1, 1), lambda n, h: (0, 0, 0, 0)),
        ],
        out_specs=pl.BlockSpec((1, Cout, 2 * tile_h, 2 * W),
                               lambda n, h: (n, 0, h, 0)),
        compiler_params=pltpu.CompilerParams(
            dimension_semantics=("parallel", "parallel"),
            # Explicit VMEM budget: blocks are capped at max_block_bytes, so the
            # double-buffered footprint stays well inside 28 MiB (v7x-safe).
            vmem_limit_bytes=28 * 1024 * 1024),
        cost_estimate=cost,
    )(x_nchw, scale, bias, w)

    return out


def reference(x_nchw, gamma, beta, run_mean, run_var, conv_w, eps=1e-5):
    """Pure-JAX reference matching PyTorch eval-mode semantics."""
    m = run_mean[None, :, None, None]
    v = run_var[None, :, None, None]
    g = gamma[None, :, None, None]
    b = beta[None, :, None, None]
    y = jnp.maximum((x_nchw - m) / jnp.sqrt(v + eps) * g + b, 0.0)
    out = jnp.einsum('nchw,cd->ndhw', y, conv_w[:, :, 0, 0])
    out = jnp.repeat(jnp.repeat(out, 2, axis=2), 2, axis=3)
    return out


if __name__ == "__main__":
    key = jax.random.PRNGKey(0)
    N, Cin, Cout, H, W = 2, 4, 8, 16, 16

    k_x, k_w = jax.random.split(key)
    x = jax.random.normal(k_x, (N, Cin, H, W), dtype=jnp.float32)

    # Deterministic "parameters" (shapes from the module's __init__).
    gamma = 1.0 + 0.1 * jnp.arange(Cin, dtype=jnp.float32)
    beta = 0.05 * jnp.arange(Cin, dtype=jnp.float32)
    run_mean = 0.01 * jnp.arange(Cin, dtype=jnp.float32)
    run_var = 1.0 + 0.02 * jnp.arange(Cin, dtype=jnp.float32)
    # ConvTranspose2d weight: (in_planes, out_planes, 1, 1)
    conv_w = 0.1 * jax.random.normal(k_w, (Cin, Cout, 1, 1), dtype=jnp.float32)

    ref = reference(x, gamma, beta, run_mean, run_var, conv_w)

    # f32 path (tight tolerance).
    out = jax.block_until_ready(
        upsample_block(x, gamma, beta, run_mean, run_var, conv_w))
    assert out.shape == (N, Cout, 2 * H, 2 * W), out.shape
    assert out.dtype == jnp.float32
    assert jnp.allclose(out, ref, atol=1e-5, rtol=1e-5), \
        float(jnp.max(jnp.abs(out - ref)))

    # bf16 I/O path: halves HBM traffic on this bandwidth-bound op; accumulation
    # inside the kernel stays in f32, so only I/O precision changes.
    x_bf16 = x.astype(jnp.bfloat16)
    out_bf16 = jax.block_until_ready(
        upsample_block(x_bf16, gamma, beta, run_mean, run_var, conv_w))
    assert out_bf16.dtype == jnp.bfloat16
    assert jnp.allclose(out_bf16.astype(jnp.float32), ref, atol=0.1, rtol=0.1), \
        float(jnp.max(jnp.abs(out_bf16.astype(jnp.float32) - ref)))

    print("KERNEL_OK")
</pallas_src>

<mosaic_0001>
module attributes {stable_mosaic.version = 11 : i64} {
  func.func @upsample_block_kernel(%arg0: i32, %arg1: i32, %arg2: memref<1x4x16x16xf32, #tpu.memory_space<vmem>>, %arg3: memref<4x1x1xf32, #tpu.memory_space<vmem>>, %arg4: memref<4x1x1xf32, #tpu.memory_space<vmem>>, %arg5: memref<4x8x1x1xf32, #tpu.memory_space<vmem>>, %arg6: memref<1x8x32x32xf32, #tpu.memory_space<vmem>>) attributes {dimension_semantics = [#tpu.dimension_semantics<parallel>, #tpu.dimension_semantics<parallel>], iteration_bounds = array<i64: 2, 1>, scalar_prefetch = 0 : i64, scratch_operands = 0 : i64, tpu.core_type = #tpu.core_type<tc>, window_params = [{transform_indices = @transform_0, window_bounds = array<i64: 1, 4, 16, 16>}, {pipeline_mode = #tpu.pipeline_mode<synchronous>, transform_indices = @transform_1, window_bounds = array<i64: 4, 1, 1>}, {pipeline_mode = #tpu.pipeline_mode<synchronous>, transform_indices = @transform_2, window_bounds = array<i64: 4, 1, 1>}, {pipeline_mode = #tpu.pipeline_mode<synchronous>, transform_indices = @transform_3, window_bounds = array<i64: 4, 8, 1, 1>}, {transform_indices = @transform_4, window_bounds = array<i64: 1, 8, 32, 32>}]} {
    %c0 = arith.constant 0 : index
    %c0_0 = arith.constant 0 : index
    %c0_1 = arith.constant 0 : index
    %c0_2 = arith.constant 0 : index
    %0 = vector.load %arg2[%c0, %c0_0, %c0_1, %c0_2] : memref<1x4x16x16xf32, #tpu.memory_space<vmem>>, vector<1x4x16x16xf32>
    %1 = vector.shape_cast %0 : vector<1x4x16x16xf32> to vector<4x16x16xf32>
    %c0_3 = arith.constant 0 : index
    %c0_4 = arith.constant 0 : index
    %c0_5 = arith.constant 0 : index
    %2 = vector.load %arg3[%c0_3, %c0_4, %c0_5] : memref<4x1x1xf32, #tpu.memory_space<vmem>>, vector<4x1x1xf32>
    %3 = vector.broadcast %2 : vector<4x1x1xf32> to vector<4x16x16xf32>
    %4 = arith.mulf %1, %3 : vector<4x16x16xf32>
    %c0_6 = arith.constant 0 : index
    %c0_7 = arith.constant 0 : index
    %c0_8 = arith.constant 0 : index
    %5 = vector.load %arg4[%c0_6, %c0_7, %c0_8] : memref<4x1x1xf32, #tpu.memory_space<vmem>>, vector<4x1x1xf32>
    %6 = vector.broadcast %5 : vector<4x1x1xf32> to vector<4x16x16xf32>
    %7 = arith.addf %4, %6 : vector<4x16x16xf32>
    %cst = arith.constant 0.000000e+00 : f32
    %8 = vector.broadcast %cst : f32 to vector<4x16x16xf32>
    %9 = arith.maximumf %7, %8 : vector<4x16x16xf32>
    %10 = vector.extract_strided_slice %9 {offsets = [0, 0, 0], sizes = [1, 16, 16], strides = [1, 1, 1]} : vector<4x16x16xf32> to vector<1x16x16xf32>
    %11 = vector.shape_cast %10 : vector<1x16x16xf32> to vector<16x16xf32>
    %c0_9 = arith.constant 0 : index
    %c0_10 = arith.constant 0 : index
    %c0_11 = arith.constant 0 : index
    %c0_12 = arith.constant 0 : index
    %12 = vector.load %arg5[%c0_9, %c0_10, %c0_11, %c0_12] : memref<4x8x1x1xf32, #tpu.memory_space<vmem>>, vector<1x1x1x1xf32>
    %13 = vector.shape_cast %12 : vector<1x1x1x1xf32> to vector<1x1xf32>
    %14 = vector.broadcast %13 : vector<1x1xf32> to vector<16x16xf32>
    %15 = arith.mulf %11, %14 : vector<16x16xf32>
    %16 = vector.extract_strided_slice %9 {offsets = [1, 0, 0], sizes = [1, 16, 16], strides = [1, 1, 1]} : vector<4x16x16xf32> to vector<1x16x16xf32>
    %17 = vector.shape_cast %16 : vector<1x16x16xf32> to vector<16x16xf32>
    %c1 = arith.constant 1 : index
    %c0_13 = arith.constant 0 : index
    %c0_14 = arith.constant 0 : index
    %c0_15 = arith.constant 0 : index
    %18 = vector.load %arg5[%c1, %c0_13, %c0_14, %c0_15] : memref<4x8x1x1xf32, #tpu.memory_space<vmem>>, vector<1x1x1x1xf32>
    %19 = vector.shape_cast %18 : vector<1x1x1x1xf32> to vector<1x1xf32>
    %20 = vector.broadcast %19 : vector<1x1xf32> to vector<16x16xf32>
    %21 = arith.mulf %17, %20 : vector<16x16xf32>
    %22 = arith.addf %15, %21 : vector<16x16xf32>
    %23 = vector.extract_strided_slice %9 {offsets = [2, 0, 0], sizes = [1, 16, 16], strides = [1, 1, 1]} : vector<4x16x16xf32> to vector<1x16x16xf32>
    %24 = vector.shape_cast %23 : vector<1x16x16xf32> to vector<16x16xf32>
    %c2 = arith.constant 2 : index
    %c0_16 = arith.constant 0 : index
    %c0_17 = arith.constant 0 : index
    %c0_18 = arith.constant 0 : index
    %25 = vector.load %arg5[%c2, %c0_16, %c0_17, %c0_18] : memref<4x8x1x1xf32, #tpu.memory_space<vmem>>, vector<1x1x1x1xf32>
    %26 = vector.shape_cast %25 : vector<1x1x1x1xf32> to vector<1x1xf32>
    %27 = vector.broadcast %26 : vector<1x1xf32> to vector<16x16xf32>
    %28 = arith.mulf %24, %27 : vector<16x16xf32>
    %29 = arith.addf %22, %28 : vector<16x16xf32>
    %30 = vector.extract_strided_slice %9 {offsets = [3, 0, 0], sizes = [1, 16, 16], strides = [1, 1, 1]} : vector<4x16x16xf32> to vector<1x16x16xf32>
    %31 = vector.shape_cast %30 : vector<1x16x16xf32> to vector<16x16xf32>
    %c3 = arith.constant 3 : index
    %c0_19 = arith.constant 0 : index
    %c0_20 = arith.constant 0 : index
    %c0_21 = arith.constant 0 : index
    %32 = vector.load %arg5[%c3, %c0_19, %c0_20, %c0_21] : memref<4x8x1x1xf32, #tpu.memory_space<vmem>>, vector<1x1x1x1xf32>
    %33 = vector.shape_cast %32 : vector<1x1x1x1xf32> to vector<1x1xf32>
    %34 = vector.broadcast %33 : vector<1x1xf32> to vector<16x16xf32>
    %35 = arith.mulf %31, %34 : vector<16x16xf32>
    %36 = arith.addf %29, %35 : vector<16x16xf32>
    %37 = tpu.transpose %36, [1, 0] : vector<16x16xf32> -> vector<16x16xf32>
    %38 = vector.shape_cast %37 : vector<16x16xf32> to vector<16x1x16xf32>
    %39 = vector.shape_cast %38 : vector<16x1x16xf32> to vector<16x1x16xf32>
    %40 = vector.broadcast %39 : vector<16x1x16xf32> to vector<16x2x16xf32>
    %41 = vector.shape_cast %40 : vector<16x2x16xf32> to vector<32x16xf32>
    %42 = tpu.transpose %41, [1, 0] : vector<32x16xf32> -> vector<16x32xf32>
    %43 = vector.shape_cast %42 : vector<16x32xf32> to vector<16x1x32xf32>
    %44 = vector.shape_cast %43 : vector<16x1x32xf32> to vector<16x1x32xf32>
    %45 = vector.broadcast %44 : vector<16x1x32xf32> to vector<16x2x32xf32>
    %46 = vector.shape_cast %45 : vector<16x2x32xf32> to vector<32x32xf32>
    %c0_22 = arith.constant 0 : index
    %c0_23 = arith.constant 0 : index
    %c0_24 = arith.constant 0 : index
    %c0_25 = arith.constant 0 : index
    %47 = vector.load %arg6[%c0_22, %c0_23, %c0_24, %c0_25] : memref<1x8x32x32xf32, #tpu.memory_space<vmem>>, vector<1x1x32x32xf32>
    %48 = vector.shape_cast %47 : vector<1x1x32x32xf32> to vector<32x32xf32>
    %49 = vector.shape_cast %46 : vector<32x32xf32> to vector<1x1x32x32xf32>
    tpu.vector_store %arg6[%c0_22, %c0_23, %c0_24, %c0_25], %49 {strides = array<i32>} : memref<1x8x32x32xf32, #tpu.memory_space<vmem>>, vector<1x1x32x32xf32>,
    %50 = vector.extract_strided_slice %9 {offsets = [0, 0, 0], sizes = [1, 16, 16], strides = [1, 1, 1]} : vector<4x16x16xf32> to vector<1x16x16xf32>
    %51 = vector.shape_cast %50 : vector<1x16x16xf32> to vector<16x16xf32>
    %c0_26 = arith.constant 0 : index
    %c1_27 = arith.constant 1 : index
    %c0_28 = arith.constant 0 : index
    %c0_29 = arith.constant 0 : index
    %52 = vector.load %arg5[%c0_26, %c1_27, %c0_28, %c0_29] : memref<4x8x1x1xf32, #tpu.memory_space<vmem>>, vector<1x1x1x1xf32>
    %53 = vector.shape_cast %52 : vector<1x1x1x1xf32> to vector<1x1xf32>
    %54 = vector.broadcast %53 : vector<1x1xf32> to vector<16x16xf32>
    %55 = arith.mulf %51, %54 : vector<16x16xf32>
    %56 = vector.extract_strided_slice %9 {offsets = [1, 0, 0], sizes = [1, 16, 16], strides = [1, 1, 1]} : vector<4x16x16xf32> to vector<1x16x16xf32>
    %57 = vector.shape_cast %56 : vector<1x16x16xf32> to vector<16x16xf32>
    %c1_30 = arith.constant 1 : index
    %c1_31 = arith.constant 1 : index
    %c0_32 = arith.constant 0 : index
    %c0_33 = arith.constant 0 : index
    %58 = vector.load %arg5[%c1_30, %c1_31, %c0_32, %c0_33] : memref<4x8x1x1xf32, #tpu.memory_space<vmem>>, vector<1x1x1x1xf32>
    %59 = vector.shape_cast %58 : vector<1x1x1x1xf32> to vector<1x1xf32>
    %60 = vector.broadcast %59 : vector<1x1xf32> to vector<16x16xf32>
    %61 = arith.mulf %57, %60 : vector<16x16xf32>
    %62 = arith.addf %55, %61 : vector<16x16xf32>
    %63 = vector.extract_strided_slice %9 {offsets = [2, 0, 0], sizes = [1, 16, 16], strides = [1, 1, 1]} : vector<4x16x16xf32> to vector<1x16x16xf32>
    %64 = vector.shape_cast %63 : vector<1x16x16xf32> to vector<16x16xf32>
    %c2_34 = arith.constant 2 : index
    %c1_35 = arith.constant 1 : index
    %c0_36 = arith.constant 0 : index
    %c0_37 = arith.constant 0 : index
    %65 = vector.load %arg5[%c2_34, %c1_35, %c0_36, %c0_37] : memref<4x8x1x1xf32, #tpu.memory_space<vmem>>, vector<1x1x1x1xf32>
    %66 = vector.shape_cast %65 : vector<1x1x1x1xf32> to vector<1x1xf32>
    %67 = vector.broadcast %66 : vector<1x1xf32> to vector<16x16xf32>
    %68 = arith.mulf %64, %67 : vector<16x16xf32>
    %69 = arith.addf %62, %68 : vector<16x16xf32>
    %70 = vector.extract_strided_slice %9 {offsets = [3, 0, 0], sizes = [1, 16, 16], strides = [1, 1, 1]} : vector<4x16x16xf32> to vector<1x16x16xf32>
    %71 = vector.shape_cast %70 : vector<1x16x16xf32> to vector<16x16xf32>
    %c3_38 = arith.constant 3 : index
    %c1_39 = arith.constant 1 : index
    %c0_40 = arith.constant 0 : index
    %c0_41 = arith.constant 0 : index
    %72 = vector.load %arg5[%c3_38, %c1_39, %c0_40, %c0_41] : memref<4x8x1x1xf32, #tpu.memory_space<vmem>>, vector<1x1x1x1xf32>
    %73 = vector.shape_cast %72 : vector<1x1x1x1xf32> to vector<1x1xf32>
    %74 = vector.broadcast %73 : vector<1x1xf32> to vector<16x16xf32>
    %75 = arith.mulf %71, %74 : vector<16x16xf32>
    %76 = arith.addf %69, %75 : vector<16x16xf32>
    %77 = tpu.transpose %76, [1, 0] : vector<16x16xf32> -> vector<16x16xf32>
    %78 = vector.shape_cast %77 : vector<16x16xf32> to vector<16x1x16xf32>
    %79 = vector.shape_cast %78 : vector<16x1x16xf32> to vector<16x1x16xf32>
    %80 = vector.broadcast %79 : vector<16x1x16xf32> to vector<16x2x16xf32>
    %81 = vector.shape_cast %80 : vector<16x2x16xf32> to vector<32x16xf32>
    %82 = tpu.transpose %81, [1, 0] : vector<32x16xf32> -> vector<16x32xf32>
    %83 = vector.shape_cast %82 : vector<16x32xf32> to vector<16x1x32xf32>
    %84 = vector.shape_cast %83 : vector<16x1x32xf32> to vector<16x1x32xf32>
    %85 = vector.broadcast %84 : vector<16x1x32xf32> to vector<16x2x32xf32>
    %86 = vector.shape_cast %85 : vector<16x2x32xf32> to vector<32x32xf32>
    %c0_42 = arith.constant 0 : index
    %c1_43 = arith.constant 1 : index
    %c0_44 = arith.constant 0 : index
    %c0_45 = arith.constant 0 : index
    %87 = vector.load %arg6[%c0_42, %c1_43, %c0_44, %c0_45] : memref<1x8x32x32xf32, #tpu.memory_space<vmem>>, vector<1x1x32x32xf32>
    %88 = vector.shape_cast %87 : vector<1x1x32x32xf32> to vector<32x32xf32>
    %89 = vector.shape_cast %86 : vector<32x32xf32> to vector<1x1x32x32xf32>
    tpu.vector_store %arg6[%c0_42, %c1_43, %c0_44, %c0_45], %89 {strides = array<i32>} : memref<1x8x32x32xf32, #tpu.memory_space<vmem>>, vector<1x1x32x32xf32>,
    %90 = vector.extract_strided_slice %9 {offsets = [0, 0, 0], sizes = [1, 16, 16], strides = [1, 1, 1]} : vector<4x16x16xf32> to vector<1x16x16xf32>
    %91 = vector.shape_cast %90 : vector<1x16x16xf32> to vector<16x16xf32>
    %c0_46 = arith.constant 0 : index
    %c2_47 = arith.constant 2 : index
    %c0_48 = arith.constant 0 : index
    %c0_49 = arith.constant 0 : index
    %92 = vector.load %arg5[%c0_46, %c2_47, %c0_48, %c0_49] : memref<4x8x1x1xf32, #tpu.memory_space<vmem>>, vector<1x1x1x1xf32>
    %93 = vector.shape_cast %92 : vector<1x1x1x1xf32> to vector<1x1xf32>
    %94 = vector.broadcast %93 : vector<1x1xf32> to vector<16x16xf32>
    %95 = arith.mulf %91, %94 : vector<16x16xf32>
    %96 = vector.extract_strided_slice %9 {offsets = [1, 0, 0], sizes = [1, 16, 16], strides = [1, 1, 1]} : vector<4x16x16xf32> to vector<1x16x16xf32>
    %97 = vector.shape_cast %96 : vector<1x16x16xf32> to vector<16x16xf32>
    %c1_50 = arith.constant 1 : index
    %c2_51 = arith.constant 2 : index
    %c0_52 = arith.constant 0 : index
    %c0_53 = arith.constant 0 : index
    %98 = vector.load %arg5[%c1_50, %c2_51, %c0_52, %c0_53] : memref<4x8x1x1xf32, #tpu.memory_space<vmem>>, vector<1x1x1x1xf32>
    %99 = vector.shape_cast %98 : vector<1x1x1x1xf32> to vector<1x1xf32>
    %100 = vector.broadcast %99 : vector<1x1xf32> to vector<16x16xf32>
    %101 = arith.mulf %97, %100 : vector<16x16xf32>
    %102 = arith.addf %95, %101 : vector<16x16xf32>
    %103 = vector.extract_strided_slice %9 {offsets = [2, 0, 0], sizes = [1, 16, 16], strides = [1, 1, 1]} : vector<4x16x16xf32> to vector<1x16x16xf32>
    %104 = vector.shape_cast %103 : vector<1x16x16xf32> to vector<16x16xf32>
    %c2_54 = arith.constant 2 : index
    %c2_55 = arith.constant 2 : index
    %c0_56 = arith.constant 0 : index
    %c0_57 = arith.constant 0 : index
    %105 = vector.load %arg5[%c2_54, %c2_55, %c0_56, %c0_57] : memref<4x8x1x1xf32, #tpu.memory_space<vmem>>, vector<1x1x1x1xf32>
    %106 = vector.shape_cast %105 : vector<1x1x1x1xf32> to vector<1x1xf32>
    %107 = vector.broadcast %106 : vector<1x1xf32> to vector<16x16xf32>
    %108 = arith.mulf %104, %107 : vector<16x16xf32>
    %109 = arith.addf %102, %108 : vector<16x16xf32>
    %110 = vector.extract_strided_slice %9 {offsets = [3, 0, 0], sizes = [1, 16, 16], strides = [1, 1, 1]} : vector<4x16x16xf32> to vector<1x16x16xf32>
    %111 = vector.shape_cast %110 : vector<1x16x16xf32> to vector<16x16xf32>
    %c3_58 = arith.constant 3 : index
    %c2_59 = arith.constant 2 : index
    %c0_60 = arith.constant 0 : index
    %c0_61 = arith.constant 0 : index
    %112 = vector.load %arg5[%c3_58, %c2_59, %c0_60, %c0_61] : memref<4x8x1x1xf32, #tpu.memory_space<vmem>>, vector<1x1x1x1xf32>
    %113 = vector.shape_cast %112 : vector<1x1x1x1xf32> to vector<1x1xf32>
    %114 = vector.broadcast %113 : vector<1x1xf32> to vector<16x16xf32>
    %115 = arith.mulf %111, %114 : vector<16x16xf32>
    %116 = arith.addf %109, %115 : vector<16x16xf32>
    %117 = tpu.transpose %116, [1, 0] : vector<16x16xf32> -> vector<16x16xf32>
    %118 = vector.shape_cast %117 : vector<16x16xf32> to vector<16x1x16xf32>
    %119 = vector.shape_cast %118 : vector<16x1x16xf32> to vector<16x1x16xf32>
    %120 = vector.broadcast %119 : vector<16x1x16xf32> to vector<16x2x16xf32>
    %121 = vector.shape_cast %120 : vector<16x2x16xf32> to vector<32x16xf32>
    %122 = tpu.transpose %121, [1, 0] : vector<32x16xf32> -> vector<16x32xf32>
    %123 = vector.shape_cast %122 : vector<16x32xf32> to vector<16x1x32xf32>
    %124 = vector.shape_cast %123 : vector<16x1x32xf32> to vector<16x1x32xf32>
    %125 = vector.broadcast %124 : vector<16x1x32xf32> to vector<16x2x32xf32>
    %126 = vector.shape_cast %125 : vector<16x2x32xf32> to vector<32x32xf32>
    %c0_62 = arith.constant 0 : index
    %c2_63 = arith.constant 2 : index
    %c0_64 = arith.constant 0 : index
    %c0_65 = arith.constant 0 : index
    %127 = vector.load %arg6[%c0_62, %c2_63, %c0_64, %c0_65] : memref<1x8x32x32xf32, #tpu.memory_space<vmem>>, vector<1x1x32x32xf32>
    %128 = vector.shape_cast %127 : vector<1x1x32x32xf32> to vector<32x32xf32>
    %129 = vector.shape_cast %126 : vector<32x32xf32> to vector<1x1x32x32xf32>
    tpu.vector_store %arg6[%c0_62, %c2_63, %c0_64, %c0_65], %129 {strides = array<i32>} : memref<1x8x32x32xf32, #tpu.memory_space<vmem>>, vector<1x1x32x32xf32>,
    %130 = vector.extract_strided_slice %9 {offsets = [0, 0, 0], sizes = [1, 16, 16], strides = [1, 1, 1]} : vector<4x16x16xf32> to vector<1x16x16xf32>
    %131 = vector.shape_cast %130 : vector<1x16x16xf32> to vector<16x16xf32>
    %c0_66 = arith.constant 0 : index
    %c3_67 = arith.constant 3 : index
    %c0_68 = arith.constant 0 : index
    %c0_69 = arith.constant 0 : index
    %132 = vector.load %arg5[%c0_66, %c3_67, %c0_68, %c0_69] : memref<4x8x1x1xf32, #tpu.memory_space<vmem>>, vector<1x1x1x1xf32>
    %133 = vector.shape_cast %132 : vector<1x1x1x1xf32> to vector<1x1xf32>
    %134 = vector.broadcast %133 : vector<1x1xf32> to vector<16x16xf32>
    %135 = arith.mulf %131, %134 : vector<16x16xf32>
    %136 = vector.extract_strided_slice %9 {offsets = [1, 0, 0], sizes = [1, 16, 16], strides = [1, 1, 1]} : vector<4x16x16xf32> to vector<1x16x16xf32>
    %137 = vector.shape_cast %136 : vector<1x16x16xf32> to vector<16x16xf32>
    %c1_70 = arith.constant 1 : index
    %c3_71 = arith.constant 3 : index
    %c0_72 = arith.constant 0 : index
    %c0_73 = arith.constant 0 : index
    %138 = vector.load %arg5[%c1_70, %c3_71, %c0_72, %c0_73] : memref<4x8x1x1xf32, #tpu.memory_space<vmem>>, vector<1x1x1x1xf32>
    %139 = vector.shape_cast %138 : vector<1x1x1x1xf32> to vector<1x1xf32>
    %140 = vector.broadcast %139 : vector<1x1xf32> to vector<16x16xf32>
    %141 = arith.mulf %137, %140 : vector<16x16xf32>
    %142 = arith.addf %135, %141 : vector<16x16xf32>
    %143 = vector.extract_strided_slice %9 {offsets = [2, 0, 0], sizes = [1, 16, 16], strides = [1, 1, 1]} : vector<4x16x16xf32> to vector<1x16x16xf32>
    %144 = vector.shape_cast %143 : vector<1x16x16xf32> to vector<16x16xf32>
    %c2_74 = arith.constant 2 : index
    %c3_75 = arith.constant 3 : index
    %c0_76 = arith.constant 0 : index
    %c0_77 = arith.constant 0 : index
    %145 = vector.load %arg5[%c2_74, %c3_75, %c0_76, %c0_77] : memref<4x8x1x1xf32, #tpu.memory_space<vmem>>, vector<1x1x1x1xf32>
    %146 = vector.shape_cast %145 : vector<1x1x1x1xf32> to vector<1x1xf32>
    %147 = vector.broadcast %146 : vector<1x1xf32> to vector<16x16xf32>
    %148 = arith.mulf %144, %147 : vector<16x16xf32>
    %149 = arith.addf %142, %148 : vector<16x16xf32>
    %150 = vector.extract_strided_slice %9 {offsets = [3, 0, 0], sizes = [1, 16, 16], strides = [1, 1, 1]} : vector<4x16x16xf32> to vector<1x16x16xf32>
    %151 = vector.shape_cast %150 : vector<1x16x16xf32> to vector<16x16xf32>
    %c3_78 = arith.constant 3 : index
    %c3_79 = arith.constant 3 : index
    %c0_80 = arith.constant 0 : index
    %c0_81 = arith.constant 0 : index
    %152 = vector.load %arg5[%c3_78, %c3_79, %c0_80, %c0_81] : memref<4x8x1x1xf32, #tpu.memory_space<vmem>>, vector<1x1x1x1xf32>
    %153 = vector.shape_cast %152 : vector<1x1x1x1xf32> to vector<1x1xf32>
    %154 = vector.broadcast %153 : vector<1x1xf32> to vector<16x16xf32>
    %155 = arith.mulf %151, %154 : vector<16x16xf32>
    %156 = arith.addf %149, %155 : vector<16x16xf32>
    %157 = tpu.transpose %156, [1, 0] : vector<16x16xf32> -> vector<16x16xf32>
    %158 = vector.shape_cast %157 : vector<16x16xf32> to vector<16x1x16xf32>
    %159 = vector.shape_cast %158 : vector<16x1x16xf32> to vector<16x1x16xf32>
    %160 = vector.broadcast %159 : vector<16x1x16xf32> to vector<16x2x16xf32>
    %161 = vector.shape_cast %160 : vector<16x2x16xf32> to vector<32x16xf32>
    %162 = tpu.transpose %161, [1, 0] : vector<32x16xf32> -> vector<16x32xf32>
    %163 = vector.shape_cast %162 : vector<16x32xf32> to vector<16x1x32xf32>
    %164 = vector.shape_cast %163 : vector<16x1x32xf32> to vector<16x1x32xf32>
    %165 = vector.broadcast %164 : vector<16x1x32xf32> to vector<16x2x32xf32>
    %166 = vector.shape_cast %165 : vector<16x2x32xf32> to vector<32x32xf32>
    %c0_82 = arith.constant 0 : index
    %c3_83 = arith.constant 3 : index
    %c0_84 = arith.constant 0 : index
    %c0_85 = arith.constant 0 : index
    %167 = vector.load %arg6[%c0_82, %c3_83, %c0_84, %c0_85] : memref<1x8x32x32xf32, #tpu.memory_space<vmem>>, vector<1x1x32x32xf32>
    %168 = vector.shape_cast %167 : vector<1x1x32x32xf32> to vector<32x32xf32>
    %169 = vector.shape_cast %166 : vector<32x32xf32> to vector<1x1x32x32xf32>
    tpu.vector_store %arg6[%c0_82, %c3_83, %c0_84, %c0_85], %169 {strides = array<i32>} : memref<1x8x32x32xf32, #tpu.memory_space<vmem>>, vector<1x1x32x32xf32>,
    %170 = vector.extract_strided_slice %9 {offsets = [0, 0, 0], sizes = [1, 16, 16], strides = [1, 1, 1]} : vector<4x16x16xf32> to vector<1x16x16xf32>
    %171 = vector.shape_cast %170 : vector<1x16x16xf32> to vector<16x16xf32>
    %c0_86 = arith.constant 0 : index
    %c4 = arith.constant 4 : index
    %c0_87 = arith.constant 0 : index
    %c0_88 = arith.constant 0 : index
    %172 = vector.load %arg5[%c0_86, %c4, %c0_87, %c0_88] : memref<4x8x1x1xf32, #tpu.memory_space<vmem>>, vector<1x1x1x1xf32>
    %173 = vector.shape_cast %172 : vector<1x1x1x1xf32> to vector<1x1xf32>
    %174 = vector.broadcast %173 : vector<1x1xf32> to vector<16x16xf32>
    %175 = arith.mulf %171, %174 : vector<16x16xf32>
    %176 = vector.extract_strided_slice %9 {offsets = [1, 0, 0], sizes = [1, 16, 16], strides = [1, 1, 1]} : vector<4x16x16xf32> to vector<1x16x16xf32>
    %177 = vector.shape_cast %176 : vector<1x16x16xf32> to vector<16x16xf32>
    %c1_89 = arith.constant 1 : index
    %c4_90 = arith.constant 4 : index
    %c0_91 = arith.constant 0 : index
    %c0_92 = arith.constant 0 : index
    %178 = vector.load %arg5[%c1_89, %c4_90, %c0_91, %c0_92] : memref<4x8x1x1xf32, #tpu.memory_space<vmem>>, vector<1x1x1x1xf32>
    %179 = vector.shape_cast %178 : vector<1x1x1x1xf32> to vector<1x1xf32>
    %180 = vector.broadcast %179 : vector<1x1xf32> to vector<16x16xf32>
    %181 = arith.mulf %177, %180 : vector<16x16xf32>
    %182 = arith.addf %175, %181 : vector<16x16xf32>
    %183 = vector.extract_strided_slice %9 {offsets = [2, 0, 0], sizes = [1, 16, 16], strides = [1, 1, 1]} : vector<4x16x16xf32> to vector<1x16x16xf32>
    %184 = vector.shape_cast %183 : vector<1x16x16xf32> to vector<16x16xf32>
    %c2_93 = arith.constant 2 : index
    %c4_94 = arith.constant 4 : index
    %c0_95 = arith.constant 0 : index
    %c0_96 = arith.constant 0 : index
    %185 = vector.load %arg5[%c2_93, %c4_94, %c0_95, %c0_96] : memref<4x8x1x1xf32, #tpu.memory_space<vmem>>, vector<1x1x1x1xf32>
    %186 = vector.shape_cast %185 : vector<1x1x1x1xf32> to vector<1x1xf32>
    %187 = vector.broadcast %186 : vector<1x1xf32> to vector<16x16xf32>
    %188 = arith.mulf %184, %187 : vector<16x16xf32>
    %189 = arith.addf %182, %188 : vector<16x16xf32>
    %190 = vector.extract_strided_slice %9 {offsets = [3, 0, 0], sizes = [1, 16, 16], strides = [1, 1, 1]} : vector<4x16x16xf32> to vector<1x16x16xf32>
    %191 = vector.shape_cast %190 : vector<1x16x16xf32> to vector<16x16xf32>
    %c3_97 = arith.constant 3 : index
    %c4_98 = arith.constant 4 : index
    %c0_99 = arith.constant 0 : index
    %c0_100 = arith.constant 0 : index
    %192 = vector.load %arg5[%c3_97, %c4_98, %c0_99, %c0_100] : memref<4x8x1x1xf32, #tpu.memory_space<vmem>>, vector<1x1x1x1xf32>
    %193 = vector.shape_cast %192 : vector<1x1x1x1xf32> to vector<1x1xf32>
    %194 = vector.broadcast %193 : vector<1x1xf32> to vector<16x16xf32>
    %195 = arith.mulf %191, %194 : vector<16x16xf32>
    %196 = arith.addf %189, %195 : vector<16x16xf32>
    %197 = tpu.transpose %196, [1, 0] : vector<16x16xf32> -> vector<16x16xf32>
    %198 = vector.shape_cast %197 : vector<16x16xf32> to vector<16x1x16xf32>
    %199 = vector.shape_cast %198 : vector<16x1x16xf32> to vector<16x1x16xf32>
    %200 = vector.broadcast %199 : vector<16x1x16xf32> to vector<16x2x16xf32>
    %201 = vector.shape_cast %200 : vector<16x2x16xf32> to vector<32x16xf32>
    %202 = tpu.transpose %201, [1, 0] : vector<32x16xf32> -> vector<16x32xf32>
    %203 = vector.shape_cast %202 : vector<16x32xf32> to vector<16x1x32xf32>
    %204 = vector.shape_cast %203 : vector<16x1x32xf32> to vector<16x1x32xf32>
    %205 = vector.broadcast %204 : vector<16x1x32xf32> to vector<16x2x32xf32>
    %206 = vector.shape_cast %205 : vector<16x2x32xf32> to vector<32x32xf32>
    %c0_101 = arith.constant 0 : index
    %c4_102 = arith.constant 4 : index
    %c0_103 = arith.constant 0 : index
    %c0_104 = arith.constant 0 : index
    %207 = vector.load %arg6[%c0_101, %c4_102, %c0_103, %c0_104] : memref<1x8x32x32xf32, #tpu.memory_space<vmem>>, vector<1x1x32x32xf32>
    %208 = vector.shape_cast %207 : vector<1x1x32x32xf32> to vector<32x32xf32>
    %209 = vector.shape_cast %206 : vector<32x32xf32> to vector<1x1x32x32xf32>
    tpu.vector_store %arg6[%c0_101, %c4_102, %c0_103, %c0_104], %209 {strides = array<i32>} : memref<1x8x32x32xf32, #tpu.memory_space<vmem>>, vector<1x1x32x32xf32>,
    %210 = vector.extract_strided_slice %9 {offsets = [0, 0, 0], sizes = [1, 16, 16], strides = [1, 1, 1]} : vector<4x16x16xf32> to vector<1x16x16xf32>
    %211 = vector.shape_cast %210 : vector<1x16x16xf32> to vector<16x16xf32>
    %c0_105 = arith.constant 0 : index
    %c5 = arith.constant 5 : index
    %c0_106 = arith.constant 0 : index
    %c0_107 = arith.constant 0 : index
    %212 = vector.load %arg5[%c0_105, %c5, %c0_106, %c0_107] : memref<4x8x1x1xf32, #tpu.memory_space<vmem>>, vector<1x1x1x1xf32>
    %213 = vector.shape_cast %212 : vector<1x1x1x1xf32> to vector<1x1xf32>
    %214 = vector.broadcast %213 : vector<1x1xf32> to vector<16x16xf32>
    %215 = arith.mulf %211, %214 : vector<16x16xf32>
    %216 = vector.extract_strided_slice %9 {offsets = [1, 0, 0], sizes = [1, 16, 16], strides = [1, 1, 1]} : vector<4x16x16xf32> to vector<1x16x16xf32>
    %217 = vector.shape_cast %216 : vector<1x16x16xf32> to vector<16x16xf32>
    %c1_108 = arith.constant 1 : index
    %c5_109 = arith.constant 5 : index
    %c0_110 = arith.constant 0 : index
    %c0_111 = arith.constant 0 : index
    %218 = vector.load %arg5[%c1_108, %c5_109, %c0_110, %c0_111] : memref<4x8x1x1xf32, #tpu.memory_space<vmem>>, vector<1x1x1x1xf32>
    %219 = vector.shape_cast %218 : vector<1x1x1x1xf32> to vector<1x1xf32>
    %220 = vector.broadcast %219 : vector<1x1xf32> to vector<16x16xf32>
    %221 = arith.mulf %217, %220 : vector<16x16xf32>
    %222 = arith.addf %215, %221 : vector<16x16xf32>
    %223 = vector.extract_strided_slice %9 {offsets = [2, 0, 0], sizes = [1, 16, 16], strides = [1, 1, 1]} : vector<4x16x16xf32> to vector<1x16x16xf32>
    %224 = vector.shape_cast %223 : vector<1x16x16xf32> to vector<16x16xf32>
    %c2_112 = arith.constant 2 : index
    %c5_113 = arith.constant 5 : index
    %c0_114 = arith.constant 0 : index
    %c0_115 = arith.constant 0 : index
    %225 = vector.load %arg5[%c2_112, %c5_113, %c0_114, %c0_115] : memref<4x8x1x1xf32, #tpu.memory_space<vmem>>, vector<1x1x1x1xf32>
    %226 = vector.shape_cast %225 : vector<1x1x1x1xf32> to vector<1x1xf32>
    %227 = vector.broadcast %226 : vector<1x1xf32> to vector<16x16xf32>
    %228 = arith.mulf %224, %227 : vector<16x16xf32>
    %229 = arith.addf %222, %228 : vector<16x16xf32>
    %230 = vector.extract_strided_slice %9 {offsets = [3, 0, 0], sizes = [1, 16, 16], strides = [1, 1, 1]} : vector<4x16x16xf32> to vector<1x16x16xf32>
    %231 = vector.shape_cast %230 : vector<1x16x16xf32> to vector<16x16xf32>
    %c3_116 = arith.constant 3 : index
    %c5_117 = arith.constant 5 : index
    %c0_118 = arith.constant 0 : index
    %c0_119 = arith.constant 0 : index
    %232 = vector.load %arg5[%c3_116, %c5_117, %c0_118, %c0_119] : memref<4x8x1x1xf32, #tpu.memory_space<vmem>>, vector<1x1x1x1xf32>
    %233 = vector.shape_cast %232 : vector<1x1x1x1xf32> to vector<1x1xf32>
    %234 = vector.broadcast %233 : vector<1x1xf32> to vector<16x16xf32>
    %235 = arith.mulf %231, %234 : vector<16x16xf32>
    %236 = arith.addf %229, %235 : vector<16x16xf32>
    %237 = tpu.transpose %236, [1, 0] : vector<16x16xf32> -> vector<16x16xf32>
    %238 = vector.shape_cast %237 : vector<16x16xf32> to vector<16x1x16xf32>
    %239 = vector.shape_cast %238 : vector<16x1x16xf32> to vector<16x1x16xf32>
    %240 = vector.broadcast %239 : vector<16x1x16xf32> to vector<16x2x16xf32>
    %241 = vector.shape_cast %240 : vector<16x2x16xf32> to vector<32x16xf32>
    %242 = tpu.transpose %241, [1, 0] : vector<32x16xf32> -> vector<16x32xf32>
    %243 = vector.shape_cast %242 : vector<16x32xf32> to vector<16x1x32xf32>
    %244 = vector.shape_cast %243 : vector<16x1x32xf32> to vector<16x1x32xf32>
    %245 = vector.broadcast %244 : vector<16x1x32xf32> to vector<16x2x32xf32>
    %246 = vector.shape_cast %245 : vector<16x2x32xf32> to vector<32x32xf32>
    %c0_120 = arith.constant 0 : index
    %c5_121 = arith.constant 5 : index
    %c0_122 = arith.constant 0 : index
    %c0_123 = arith.constant 0 : index
    %247 = vector.load %arg6[%c0_120, %c5_121, %c0_122, %c0_123] : memref<1x8x32x32xf32, #tpu.memory_space<vmem>>, vector<1x1x32x32xf32>
    %248 = vector.shape_cast %247 : vector<1x1x32x32xf32> to vector<32x32xf32>
    %249 = vector.shape_cast %246 : vector<32x32xf32> to vector<1x1x32x32xf32>
    tpu.vector_store %arg6[%c0_120, %c5_121, %c0_122, %c0_123], %249 {strides = array<i32>} : memref<1x8x32x32xf32, #tpu.memory_space<vmem>>, vector<1x1x32x32xf32>,
    %250 = vector.extract_strided_slice %9 {offsets = [0, 0, 0], sizes = [1, 16, 16], strides = [1, 1, 1]} : vector<4x16x16xf32> to vector<1x16x16xf32>
    %251 = vector.shape_cast %250 : vector<1x16x16xf32> to vector<16x16xf32>
    %c0_124 = arith.constant 0 : index
    %c6 = arith.constant 6 : index
    %c0_125 = arith.constant 0 : index
    %c0_126 = arith.constant 0 : index
    %252 = vector.load %arg5[%c0_124, %c6, %c0_125, %c0_126] : memref<4x8x1x1xf32, #tpu.memory_space<vmem>>, vector<1x1x1x1xf32>
    %253 = vector.shape_cast %252 : vector<1x1x1x1xf32> to vector<1x1xf32>
    %254 = vector.broadcast %253 : vector<1x1xf32> to vector<16x16xf32>
    %255 = arith.mulf %251, %254 : vector<16x16xf32>
    %256 = vector.extract_strided_slice %9 {offsets = [1, 0, 0], sizes = [1, 16, 16], strides = [1, 1, 1]} : vector<4x16x16xf32> to vector<1x16x16xf32>
    %257 = vector.shape_cast %256 : vector<1x16x16xf32> to vector<16x16xf32>
    %c1_127 = arith.constant 1 : index
    %c6_128 = arith.constant 6 : index
    %c0_129 = arith.constant 0 : index
    %c0_130 = arith.constant 0 : index
    %258 = vector.load %arg5[%c1_127, %c6_128, %c0_129, %c0_130] : memref<4x8x1x1xf32, #tpu.memory_space<vmem>>, vector<1x1x1x1xf32>
    %259 = vector.shape_cast %258 : vector<1x1x1x1xf32> to vector<1x1xf32>
    %260 = vector.broadcast %259 : vector<1x1xf32> to vector<16x16xf32>
    %261 = arith.mulf %257, %260 : vector<16x16xf32>
    %262 = arith.addf %255, %261 : vector<16x16xf32>
    %263 = vector.extract_strided_slice %9 {offsets = [2, 0, 0], sizes = [1, 16, 16], strides = [1, 1, 1]} : vector<4x16x16xf32> to vector<1x16x16xf32>
    %264 = vector.shape_cast %263 : vector<1x16x16xf32> to vector<16x16xf32>
    %c2_131 = arith.constant 2 : index
    %c6_132 = arith.constant 6 : index
    %c0_133 = arith.constant 0 : index
    %c0_134 = arith.constant 0 : index
    %265 = vector.load %arg5[%c2_131, %c6_132, %c0_133, %c0_134] : memref<4x8x1x1xf32, #tpu.memory_space<vmem>>, vector<1x1x1x1xf32>
    %266 = vector.shape_cast %265 : vector<1x1x1x1xf32> to vector<1x1xf32>
    %267 = vector.broadcast %266 : vector<1x1xf32> to vector<16x16xf32>
    %268 = arith.mulf %264, %267 : vector<16x16xf32>
    %269 = arith.addf %262, %268 : vector<16x16xf32>
    %270 = vector.extract_strided_slice %9 {offsets = [3, 0, 0], sizes = [1, 16, 16], strides = [1, 1, 1]} : vector<4x16x16xf32> to vector<1x16x16xf32>
    %271 = vector.shape_cast %270 : vector<1x16x16xf32> to vector<16x16xf32>
    %c3_135 = arith.constant 3 : index
    %c6_136 = arith.constant 6 : index
    %c0_137 = arith.constant 0 : index
    %c0_138 = arith.constant 0 : index
    %272 = vector.load %arg5[%c3_135, %c6_136, %c0_137, %c0_138] : memref<4x8x1x1xf32, #tpu.memory_space<vmem>>, vector<1x1x1x1xf32>
    %273 = vector.shape_cast %272 : vector<1x1x1x1xf32> to vector<1x1xf32>
    %274 = vector.broadcast %273 : vector<1x1xf32> to vector<16x16xf32>
    %275 = arith.mulf %271, %274 : vector<16x16xf32>
    %276 = arith.addf %269, %275 : vector<16x16xf32>
    %277 = tpu.transpose %276, [1, 0] : vector<16x16xf32> -> vector<16x16xf32>
    %278 = vector.shape_cast %277 : vector<16x16xf32> to vector<16x1x16xf32>
    %279 = vector.shape_cast %278 : vector<16x1x16xf32> to vector<16x1x16xf32>
    %280 = vector.broadcast %279 : vector<16x1x16xf32> to vector<16x2x16xf32>
    %281 = vector.shape_cast %280 : vector<16x2x16xf32> to vector<32x16xf32>
    %282 = tpu.transpose %281, [1, 0] : vector<32x16xf32> -> vector<16x32xf32>
    %283 = vector.shape_cast %282 : vector<16x32xf32> to vector<16x1x32xf32>
    %284 = vector.shape_cast %283 : vector<16x1x32xf32> to vector<16x1x32xf32>
    %285 = vector.broadcast %284 : vector<16x1x32xf32> to vector<16x2x32xf32>
    %286 = vector.shape_cast %285 : vector<16x2x32xf32> to vector<32x32xf32>
    %c0_139 = arith.constant 0 : index
    %c6_140 = arith.constant 6 : index
    %c0_141 = arith.constant 0 : index
    %c0_142 = arith.constant 0 : index
    %287 = vector.load %arg6[%c0_139, %c6_140, %c0_141, %c0_142] : memref<1x8x32x32xf32, #tpu.memory_space<vmem>>, vector<1x1x32x32xf32>
    %288 = vector.shape_cast %287 : vector<1x1x32x32xf32> to vector<32x32xf32>
    %289 = vector.shape_cast %286 : vector<32x32xf32> to vector<1x1x32x32xf32>
    tpu.vector_store %arg6[%c0_139, %c6_140, %c0_141, %c0_142], %289 {strides = array<i32>} : memref<1x8x32x32xf32, #tpu.memory_space<vmem>>, vector<1x1x32x32xf32>,
    %290 = vector.extract_strided_slice %9 {offsets = [0, 0, 0], sizes = [1, 16, 16], strides = [1, 1, 1]} : vector<4x16x16xf32> to vector<1x16x16xf32>
    %291 = vector.shape_cast %290 : vector<1x16x16xf32> to vector<16x16xf32>
    %c0_143 = arith.constant 0 : index
    %c7 = arith.constant 7 : index
    %c0_144 = arith.constant 0 : index
    %c0_145 = arith.constant 0 : index
    %292 = vector.load %arg5[%c0_143, %c7, %c0_144, %c0_145] : memref<4x8x1x1xf32, #tpu.memory_space<vmem>>, vector<1x1x1x1xf32>
    %293 = vector.shape_cast %292 : vector<1x1x1x1xf32> to vector<1x1xf32>
    %294 = vector.broadcast %293 : vector<1x1xf32> to vector<16x16xf32>
    %295 = arith.mulf %291, %294 : vector<16x16xf32>
    %296 = vector.extract_strided_slice %9 {offsets = [1, 0, 0], sizes = [1, 16, 16], strides = [1, 1, 1]} : vector<4x16x16xf32> to vector<1x16x16xf32>
    %297 = vector.shape_cast %296 : vector<1x16x16xf32> to vector<16x16xf32>
    %c1_146 = arith.constant 1 : index
    %c7_147 = arith.constant 7 : index
    %c0_148 = arith.constant 0 : index
    %c0_149 = arith.constant 0 : index
    %298 = vector.load %arg5[%c1_146, %c7_147, %c0_148, %c0_149] : memref<4x8x1x1xf32, #tpu.memory_space<vmem>>, vector<1x1x1x1xf32>
    %299 = vector.shape_cast %298 : vector<1x1x1x1xf32> to vector<1x1xf32>
    %300 = vector.broadcast %299 : vector<1x1xf32> to vector<16x16xf32>
    %301 = arith.mulf %297, %300 : vector<16x16xf32>
    %302 = arith.addf %295, %301 : vector<16x16xf32>
    %303 = vector.extract_strided_slice %9 {offsets = [2, 0, 0], sizes = [1, 16, 16], strides = [1, 1, 1]} : vector<4x16x16xf32> to vector<1x16x16xf32>
    %304 = vector.shape_cast %303 : vector<1x16x16xf32> to vector<16x16xf32>
    %c2_150 = arith.constant 2 : index
    %c7_151 = arith.constant 7 : index
    %c0_152 = arith.constant 0 : index
    %c0_153 = arith.constant 0 : index
    %305 = vector.load %arg5[%c2_150, %c7_151, %c0_152, %c0_153] : memref<4x8x1x1xf32, #tpu.memory_space<vmem>>, vector<1x1x1x1xf32>
    %306 = vector.shape_cast %305 : vector<1x1x1x1xf32> to vector<1x1xf32>
    %307 = vector.broadcast %306 : vector<1x1xf32> to vector<16x16xf32>
    %308 = arith.mulf %304, %307 : vector<16x16xf32>
    %309 = arith.addf %302, %308 : vector<16x16xf32>
    %310 = vector.extract_strided_slice %9 {offsets = [3, 0, 0], sizes = [1, 16, 16], strides = [1, 1, 1]} : vector<4x16x16xf32> to vector<1x16x16xf32>
    %311 = vector.shape_cast %310 : vector<1x16x16xf32> to vector<16x16xf32>
    %c3_154 = arith.constant 3 : index
    %c7_155 = arith.constant 7 : index
    %c0_156 = arith.constant 0 : index
    %c0_157 = arith.constant 0 : index
    %312 = vector.load %arg5[%c3_154, %c7_155, %c0_156, %c0_157] : memref<4x8x1x1xf32, #tpu.memory_space<vmem>>, vector<1x1x1x1xf32>
    %313 = vector.shape_cast %312 : vector<1x1x1x1xf32> to vector<1x1xf32>
    %314 = vector.broadcast %313 : vector<1x1xf32> to vector<16x16xf32>
    %315 = arith.mulf %311, %314 : vector<16x16xf32>
    %316 = arith.addf %309, %315 : vector<16x16xf32>
    %317 = tpu.transpose %316, [1, 0] : vector<16x16xf32> -> vector<16x16xf32>
    %318 = vector.shape_cast %317 : vector<16x16xf32> to vector<16x1x16xf32>
    %319 = vector.shape_cast %318 : vector<16x1x16xf32> to vector<16x1x16xf32>
    %320 = vector.broadcast %319 : vector<16x1x16xf32> to vector<16x2x16xf32>
    %321 = vector.shape_cast %320 : vector<16x2x16xf32> to vector<32x16xf32>
    %322 = tpu.transpose %321, [1, 0] : vector<32x16xf32> -> vector<16x32xf32>
    %323 = vector.shape_cast %322 : vector<16x32xf32> to vector<16x1x32xf32>
    %324 = vector.shape_cast %323 : vector<16x1x32xf32> to vector<16x1x32xf32>
    %325 = vector.broadcast %324 : vector<16x1x32xf32> to vector<16x2x32xf32>
    %326 = vector.shape_cast %325 : vector<16x2x32xf32> to vector<32x32xf32>
    %c0_158 = arith.constant 0 : index
    %c7_159 = arith.constant 7 : index
    %c0_160 = arith.constant 0 : index
    %c0_161 = arith.constant 0 : index
    %327 = vector.load %arg6[%c0_158, %c7_159, %c0_160, %c0_161] : memref<1x8x32x32xf32, #tpu.memory_space<vmem>>, vector<1x1x32x32xf32>
    %328 = vector.shape_cast %327 : vector<1x1x32x32xf32> to vector<32x32xf32>
    %329 = vector.shape_cast %326 : vector<32x32xf32> to vector<1x1x32x32xf32>
    tpu.vector_store %arg6[%c0_158, %c7_159, %c0_160, %c0_161], %329 {strides = array<i32>} : memref<1x8x32x32xf32, #tpu.memory_space<vmem>>, vector<1x1x32x32xf32>,
    return
  }
  func.func @transform_0(%arg0: i32, %arg1: i32) -> (i32, i32, i32, i32) {
    %c0_i32 = arith.constant 0 : i32
    %c0_i32_0 = arith.constant 0 : i32
    %c0_i32_1 = arith.constant 0 : i32
    return %arg0, %c0_i32, %arg1, %c0_i32_0 : i32, i32, i32, i32
  }
  func.func @transform_1(%arg0: i32, %arg1: i32) -> (i32, i32, i32) {
    %c0_i32 = arith.constant 0 : i32
    %c0_i32_0 = arith.constant 0 : i32
    %c0_i32_1 = arith.constant 0 : i32
    %c0_i32_2 = arith.constant 0 : i32
    return %c0_i32, %c0_i32_0, %c0_i32_1 : i32, i32, i32
  }
  func.func @transform_2(%arg0: i32, %arg1: i32) -> (i32, i32, i32) {
    %c0_i32 = arith.constant 0 : i32
    %c0_i32_0 = arith.constant 0 : i32
    %c0_i32_1 = arith.constant 0 : i32
    %c0_i32_2 = arith.constant 0 : i32
    return %c0_i32, %c0_i32_0, %c0_i32_1 : i32, i32, i32
  }
  func.func @transform_3(%arg0: i32, %arg1: i32) -> (i32, i32, i32, i32) {
    %c0_i32 = arith.constant 0 : i32
    %c0_i32_0 = arith.constant 0 : i32
    %c0_i32_1 = arith.constant 0 : i32
    %c0_i32_2 = arith.constant 0 : i32
    %c0_i32_3 = arith.constant 0 : i32
    return %c0_i32, %c0_i32_0, %c0_i32_1, %c0_i32_2 : i32, i32, i32, i32
  }
  func.func @transform_4(%arg0: i32, %arg1: i32) -> (i32, i32, i32, i32) {
    %c0_i32 = arith.constant 0 : i32
    %c0_i32_0 = arith.constant 0 : i32
    %c0_i32_1 = arith.constant 0 : i32
    return %arg0, %c0_i32, %arg1, %c0_i32_0 : i32, i32, i32, i32
  }
}

</mosaic_0001>

<bundles_post_ra>
// kernel: tpu_custom_call.1
= control target key start
LH: loop header
LB: loop body
LE: loop exit
PB: predicated region body
PF: predicated region fallthrough
CT: control target
= control target key end

     0   :  { %9 = vsyncpa [#allocation3], 0  ;;  %s6628_s0 = inlined_call_operand.hbm [shape: f32[2,4,16,16], index: 0, kind: input, shape index: {}]   ;;  %s6629_s1 = inlined_call_operand.vmem [shape: f32[4,1,1], index: 1, kind: input, shape index: {}]   ;;  %s6630_s2 = inlined_call_operand.vmem [shape: f32[4,1,1], index: 2, kind: input, shape index: {}]   ;;  %s6631_s3 = inlined_call_operand.vmem [shape: f32[4,8,1,1], index: 3, kind: input, shape index: {}]   ;;  %s6632_s4 = inlined_call_operand.hbm [shape: f32[2,8,32,32], index: 4, kind: output, shape index: {}]  }
   0x1   :  { %11 = vsyncpa [#allocation3 + $0x1], 0 }
   0x2   :  { %12 = vsyncpa [#allocation4], 0 }
   0x3   :  { %14 = vsyncpa [#allocation4 + $0x1], 0  ;;  %s5574_s15 = smov 0   ;;  %s5576_s16 = smov 0  }
   0x4   :  { %s5578_s17 = smov 0   ;;  %s5580_s18 = smov 0  }
   0x5   :  { %s5582_s19 = smov 0   ;;  %s5584_s20 = smov 0  }
   0x6 LB: > { %s5242_s21 = sadd.s32 4294967295, %s5538_s20   ;;  %s5243_s22 = sadd.s32 4294967294, %s5538_s20   ;;  %s5538_s20 = sphi %s5584_s20, %s20_s20   ;;  %s5534_s19 = sphi %s5582_s19, %s6643_s19   ;;  %s5530_s18 = sphi %s5580_s18, %s6642_s18   ;;  %s5526_s17 = sphi %s5578_s17, %s6641_s17   ;;  %s5522_s16 = sphi %s5576_s16, %s6640_s16   ;;  %s5518_s15 = sphi %s5574_s15, %s6639_s15  }
   0x7   : > { %s32_s23 = sadd.s32 1, %s5534_s19  ;;  %s41_s24 = sadd.s32 1, %s5526_s17 }
   0x8   : > { %p34_p0 = scmp.ge.s32.totalorder %s32_s23, 2  ;;  %p48_p1 = scmp.ne.s32.totalorder %s5526_s17, %s5522_s16 }
   0x9   : > { %p49_p2 = scmp.eq.s32.totalorder %s5538_s20, 0  ;;  %p54_p3 = scmp.ne.s32.totalorder %s5522_s16, %s5518_s15 }
   0xa   : > { %s6645_s23 = smov (%p34_p0, %s32_s23), 0  ;;  %p55_p5 = scmp.eq.s32.totalorder %s5242_s21, 0 }
   0xb   : > { %p5615_p4 = por %p49_p2, %p48_p1  ;;  %s36_s26 = ssub.s32 %s5534_s19, %s6645_s23 }
   0xc   : > { %p143_p6 = scmp.eq.s32.totalorder %s5242_s21, 1  ;;  %p39_p7 = scmp.eq.s32.totalorder %s36_s26, 0 }
   0xd   : > { %p5621_p8 = por %p55_p5, %p54_p3  ;;  %p149_p10 = scmp.eq.s32.totalorder %s5243_s22, 1 }
   0xe   : > { %p5625_p9 = por %p143_p6, %p48_p1  ;;  %p5370_p13 = scmp.lt.s32.totalorder %s5538_s20, 2 }
   0xf   : > { %s5630_s29 = scalar_select %p39_p7, %s5526_s17, %s41_s24  }
  0x10   : > { %p5632_p11 = por %p149_p10, %p54_p3  ;;  %s178_s5 = sand.u32 1, %s5526_s17  }
  0x11   : > { %s5246_s6 = sshll.u32 %s178_s5, 6  ;;  %s5356_s7 = sshll.u32 %s5534_s19, 10 }
  0x12   : > { %s190_s10 = scalar_lea.hbm %s6628_s0, %s5356_s7  ;;  %s182_s11 = scalar_lea.vmem [#allocation2], %s5246_s6 }
  0x13   : > { %s191_s12 = sshll.u32 %s182_s11, 4  ;;  %p5645_p0 = pnand %p5370_p13, %p5615_p4  ;;  %s192_s12 = int_to_ptr.vmem [resolvable:$true] %s191_s12 }
  0x14   : > { %p5249_p1 = scmp.ge.s32.totalorder %s5538_s20, 1  ;;  %s179_s14 = scalar_lea.sflag [#allocation3], %s178_s5 }
  0x15   : > { %p5432_p2 = pneg %p5645_p0  ;;  %s5443_s21 = scalar_lea.vmem %s192_s12, 1024 }
  0x16   : > { %p5444_p3 = scmp.ne.s32.totalorder %s192_s12, %s5443_s21  ;;  %s5540_s22 = smov [#allocation2]  }
  0x17   : > { %s5448_s24 = sshll.u32 %s5540_s22, 4  ;;  %s5449_s24 = int_to_ptr.vmem [resolvable:$false] %s5448_s24 }
  0x18   : > { %p5446_p5 = pnand %p5444_p3, %p5432_p2  ;;  %s5450_s26 = scalar_lea.vmem %s5449_s24, 2048 }
  0x19   : > { %p5451_p7 = scmp.lt.s32.totalorder %s192_s12, %s5449_s24  ;;  %p5452_p10 = scmp.lt.s32.totalorder %s5450_s26, %s5443_s21 }
  0x1a   : > { %p5447_p6 = pneg %p5446_p5 }
  0x1b   : > { %p5453_p12 = por %p5452_p10, %p5451_p7 }
  0x1d   : > { %p5454_p4 = pnand %p5453_p12, %p5447_p6 }
  0x1f   : > { %5457 = shalt.err (!%p5454_p4)
}
  0x20   : > { %s5541_s25 = smov 128   ;;  %s5542_s5 = smov 8  }
  0x21   : > { %5365 = dma.hbm_to_vmem [thread:$0]  (!%p5645_p0), %s190_s10, 1024, %s192_s12, %s179_s14, %s5541_s25, %s5541_s25, %s5542_s5  }
  0x22   : > { %p199_p13 = scmp.lt.s32.totalorder %s5538_s20, 3 }
  0x24   : > { %p200_p2 = pnand %p5249_p1, %p199_p13 }
  0x25   : > { %s5658_s6 = sand.u32 (!%p200_p2), 1, %s5522_s16  }
  0x26   : > { %203 = sbr.rel (%p200_p2) target bundleno = 753 (0x2f1), region = 36  ;;  %s5250_s7 = sshll.u32 (!%p200_p2), %s5658_s6, 6 }
  0x27   : > { %s206_s8 = scalar_lea.sflag (!%p200_p2), [#allocation3], %s5658_s6  ;;  %s5662_s9 = scalar_lea.vmem (!%p200_p2), [#allocation2], %s5250_s7 }
  0x2b   : > { %5509 = dma.done.wait (%p5621_p8), %s206_s8, 1024  }
  0x2c   : > { %5511 = vsyncadd (%p5621_p8), %s206_s8, 4294966272  ;;  %v5543_v0 = vmov 0   ;;  %v5254_v1 = vld [vmem:[%s6629_s1 + $0x2] ss:$0 sm:$0xff]  ;;  %v5252_v2 = vld [vmem:[%s6629_s1] ss:$0 sm:$0xff] }
  0x2d   : > { %5429 = vset.pattern.permute.xlu1 %v5543_v0  ;;  %5428 = vset.pattern.permute.xlu0 %v5543_v0  ;;  %v5255_v3 = vld [vmem:[%s6629_s1 + $0x3] ss:$0 sm:$0xff]  ;;  %v5253_v4 = vld [vmem:[%s6629_s1 + $0x1] ss:$0 sm:$0xff]  ;;  %v5256_v6 = vld [vmem:[%s6630_s2] ss:$0 sm:$0xff] }
  0x2e   : > { %277 = vperm.xlu1 %5429, %v5254_v1   ;;  %269 = vperm.xlu0 %5428, %v5252_v2   ;;  %v5257_v5 = vld [vmem:[%s6630_s2 + $0x1] ss:$0 sm:$0xff]  ;;  %v5259_v7 = vld [vmem:[%s6630_s2 + $0x3] ss:$0 sm:$0xff]  ;;  %v5258_v8 = vld [vmem:[%s6630_s2 + $0x2] ss:$0 sm:$0xff] }
  0x2f   : > { %v5262_v9 = vld [vmem:[%s6631_s3 + $0x8] ss:$0 sm:$0xff]  ;;  %v5260_v10 = vld [vmem:[%s6631_s3] ss:$0 sm:$0xff]  ;;  %v5266_v11 = vld [vmem:[%s6631_s3 + $0x18] ss:$0 sm:$0xff] }
  0x30   : > { %v5264_v12 = vld [vmem:[%s6631_s3 + $0x10] ss:$0 sm:$0xff]  ;;  %v5270_v13 = vld [vmem:[%s6631_s3 + $0x9] ss:$0 sm:$0xff]  ;;  %v5268_v14 = vld [vmem:[%s6631_s3 + $0x1] ss:$0 sm:$0xff] }
  0x31   : > { %v5282_v15 = vld [vmem:[%s6631_s3 + $0xa] ss:$0 sm:$0xff]  ;;  %v5272_v16 = vld [vmem:[%s6631_s3 + $0x11] ss:$0 sm:$0xff]  ;;  %v5294_v17 = vld [vmem:[%s6631_s3 + $0xb] ss:$0 sm:$0xff] }
  0x32   : > { %281 = vperm.xlu1 %5429, %v5255_v3   ;;  %273 = vperm.xlu0 %5428, %v5253_v4   ;;  %v5274_v18 = vld [vmem:[%s6631_s3 + $0x19] ss:$0 sm:$0xff]  ;;  %v5306_v19 = vld [vmem:[%s6631_s3 + $0xc] ss:$0 sm:$0xff]  ;;  %v5280_v20 = vld [vmem:[%s6631_s3 + $0x2] ss:$0 sm:$0xff] }
  0x33   : > { %v5316_v21 = vld [vmem:[%s6631_s3 + $0x5] ss:$0 sm:$0xff]  ;;  %v5284_v22 = vld [vmem:[%s6631_s3 + $0x12] ss:$0 sm:$0xff]  ;;  %v5318_v23 = vld [vmem:[%s6631_s3 + $0xd] ss:$0 sm:$0xff] }
  0x34   : > { %v5286_v24 = vld [vmem:[%s6631_s3 + $0x1a] ss:$0 sm:$0xff]  ;;  %v5328_v25 = vld [vmem:[%s6631_s3 + $0x6] ss:$0 sm:$0xff]  ;;  %v5292_v26 = vld [vmem:[%s6631_s3 + $0x3] ss:$0 sm:$0xff] }
  0x35   : > { %v5330_v27 = vld [vmem:[%s6631_s3 + $0xe] ss:$0 sm:$0xff]  ;;  %v5296_v28 = vld [vmem:[%s6631_s3 + $0x13] ss:$0 sm:$0xff]  ;;  %v5340_v29 = vld [vmem:[%s6631_s3 + $0x7] ss:$0 sm:$0xff] }
  0x36   : > { %321 = vperm.xlu1 %5429, %v5257_v5   ;;  %317 = vperm.xlu0 %5428, %v5256_v6   ;;  %v5298_v30 = vld [vmem:[%s6631_s3 + $0x1b] ss:$0 sm:$0xff]  ;;  %v5342_v31 = vld [vmem:[%s6631_s3 + $0xf] ss:$0 sm:$0xff]  ;;  %v5304_v32 = vld [vmem:[%s6631_s3 + $0x4] ss:$0 sm:$0xff] }
  0x37   : > { %v5320_v33 = vld [vmem:[%s6631_s3 + $0x15] ss:$0 sm:$0xff]  ;;  %v5308_v34 = vld [vmem:[%s6631_s3 + $0x14] ss:$0 sm:$0xff]  ;;  %v5332_v35 = vld [vmem:[%s6631_s3 + $0x16] ss:$0 sm:$0xff] }
  0x38   : > { %v5310_v36 = vld [vmem:[%s6631_s3 + $0x1c] ss:$0 sm:$0xff]  ;;  %v5344_v37 = vld [vmem:[%s6631_s3 + $0x17] ss:$0 sm:$0xff]  ;;  %v5322_v38 = vld [vmem:[%s6631_s3 + $0x1d] ss:$0 sm:$0xff] }
  0x39   : > { %v5334_v39 = vld [vmem:[%s6631_s3 + $0x1e] ss:$0 sm:$0xff]  ;;  %v5346_v40 = vld [vmem:[%s6631_s3 + $0x1f] ss:$0 sm:$0xff]  ;;  %v236_v45 = vld [vmem:[%s5662_s9] sm:$0xff]  ;;  %vm941_vm0 = vcmask 261120  }
  0x3a   : > { %329 = vperm.xlu1 %5429, %v5259_v7   ;;  %325 = vperm.xlu0 %5428, %v5258_v8   ;;  %v238_v46 = vld [vmem:[%s5662_s9 + $0x10] sm:$0xff]  ;;  %v237_v49 = vld [vmem:[%s5662_s9 + $0x8] sm:$0xff]  ;;  %v239_v51 = vld [vmem:[%s5662_s9 + $0x18] sm:$0xff]  ;;  %s5357_s5 = sshll.u32 %s5530_s18, 12  ;;  %s5140_s18 = scalar_lea.sflag [#allocation4], %s5658_s6 }
  0x3b   : > { %v240_v53 = vld [vmem:[%s5662_s9 + $0x20] sm:$0xff]  ;;  %v241_v54 = vld [vmem:[%s5662_s9 + $0x28] sm:$0xff]  ;;  %v242_v62 = vld [vmem:[%s5662_s9 + $0x30] sm:$0xff]  ;;  %s6574_s11 = scalar_lea.hbm %s6632_s4, %s5357_s5  ;;  %s5546_s13 = smov [#allocation5]  }
  0x3c   : > { %s5462_s14 = sshll.u32 %s5546_s13, 4  ;;  %s5463_s14 = int_to_ptr.vmem [resolvable:$false] %s5462_s14 }
  0x3d   : > { %s5464_s21 = scalar_lea.vmem %s5463_s14, 8192 }
  0x3e   : > { %368 = vperm.xlu1 %5429, %v5262_v9   ;;  %355 = vperm.xlu0 %5428, %v5260_v10   ;;  %v243_v9 = vld [vmem:[%s5662_s9 + $0x38] sm:$0xff]  ;;  %s5251_s9 = sshll.u32 %s5658_s6, 8 }
  0x3f   : > { %s6155_s25 = scalar_lea.vmem [#allocation5], %s5251_s9 }
  0x40   : > { %s5155_s7 = sshll.u32 %s6155_s25, 4  ;;  %s6576_s7 = int_to_ptr.vmem [resolvable:$true] %s5155_s7 }
  0x41   : > { %s5458_s12 = scalar_lea.vmem %s6576_s7, 4096  ;;  %p5465_p1 = scmp.lt.s32.totalorder %s6576_s7, %s5463_s14 }
  0x42   : > { %398 = vperm.xlu1 %5429, %v5266_v11   ;;  %383 = vperm.xlu0 %5428, %v5264_v12   ;;  %p5459_p8 = scmp.ne.s32.totalorder %s6576_s7, %s5458_s12  ;;  %p5466_p3 = scmp.lt.s32.totalorder %s5464_s21, %s5458_s12 }
  0x44   : > { %p5460_p12 = pnand %p5459_p8, %p5625_p9  ;;  %p5467_p5 = por %p5466_p3, %p5465_p1 }
  0x46   : > { %967 = vperm.xlu1 %5429, %v5270_v13   ;;  %954 = vperm.xlu0 %5428, %v5268_v14   ;;  %p5461_p0 = pneg %p5460_p12 }
  0x48   : > { %p5468_p6 = pnand %p5467_p5, %p5461_p0 }
  0x4a   : > { %1566 = vperm.xlu1 %5429, %v5282_v15   ;;  %982 = vperm.xlu0 %5428, %v5272_v16  }
  0x4e   : > { %2165 = vperm.xlu1 %5429, %v5294_v17   ;;  %997 = vperm.xlu0 %5428, %v5274_v18  }
  0x52   : > { %2764 = vperm.xlu1 %5429, %v5306_v19   ;;  %1553 = vperm.xlu0 %5428, %v5280_v20  }
  0x56   : > { %3350 = vperm.xlu1 %5429, %v5316_v21   ;;  %1581 = vperm.xlu0 %5428, %v5284_v22  }
  0x5a   : > { %3363 = vperm.xlu1 %5429, %v5318_v23   ;;  %1596 = vperm.xlu0 %5428, %v5286_v24  }
  0x5e   : > { %3949 = vperm.xlu1 %5429, %v5328_v25   ;;  %2152 = vperm.xlu0 %5428, %v5292_v26  }
  0x62   : > { %3962 = vperm.xlu1 %5429, %v5330_v27   ;;  %2180 = vperm.xlu0 %5428, %v5296_v28  }
  0x66   : > { %4548 = vperm.xlu1 %5429, %v5340_v29   ;;  %2195 = vperm.xlu0 %5428, %v5298_v30  }
  0x6a   : > { %4561 = vperm.xlu1 %5429, %v5342_v31   ;;  %2751 = vperm.xlu0 %5428, %v5304_v32  }
  0x6e   : > { %3378 = vperm.xlu1 %5429, %v5320_v33   ;;  %2779 = vperm.xlu0 %5428, %v5308_v34  }
  0x72   : > { %3977 = vperm.xlu1 %5429, %v5332_v35   ;;  %2794 = vperm.xlu0 %5428, %v5310_v36  }
  0x76   : > { %4576 = vperm.xlu1 %5429, %v5344_v37   ;;  %3393 = vperm.xlu0 %5428, %v5322_v38  }
  0x7a   : > { %3992 = vperm.xlu1 %5429, %v5334_v39  }
  0x7e   : > { %4591 = vperm.xlu1 %5429, %v5346_v40  }
  0xa9   : > { %v278_v41 = vpop.permute.xlu1 %277  ;;  %v270_v42 = vpop.permute.xlu0 %269 }
  0xaa   : > { %v284_v50 = vmul.f32 %v270_v42, %v236_v45  ;;  %v285_v57 = vmul.f32 %v270_v42, %v237_v49  ;;  %v288_v61 = vmul.f32 %v278_v41, %v240_v53  ;;  %v289_v63 = vmul.f32 %v278_v41, %v241_v54 }
  0xad   : > { %v282_v43 = vpop.permute.xlu1 %281  ;;  %v274_v44 = vpop.permute.xlu0 %273 }
  0xae   : > { %v286_v52 = vmul.f32 %v274_v44, %v238_v46  ;;  %v287_v58 = vmul.f32 %v274_v44, %v239_v51  ;;  %v290_v5 = vmul.f32 %v282_v43, %v242_v62  ;;  %v291_v16 = vmul.f32 %v282_v43, %v243_v9 }
  0xb1   : > { %v322_v47 = vpop.permute.xlu1 %321  ;;  %v318_v48 = vpop.permute.xlu0 %317 }
  0xb2   : > { %v334_v55 = vadd.f32 %v322_v47, %v286_v52  ;;  %v332_v56 = vadd.f32 %v318_v48, %v284_v50  ;;  %v335_v0 = vadd.f32 %v322_v47, %v287_v58  ;;  %v333_v1 = vadd.f32 %v318_v48, %v285_v57 }
  0xb4   : > { %v5795_v2 = vmax.f32 %v334_v55, 0.0  ;;  %v5797_v3 = vmax.f32 %v332_v56, 0.0  ;;  %v5802_v12 = vmax.f32 %v335_v0, 0.0  ;;  %v5804_v13 = vmax.f32 %v333_v1, 0.0 }
  0xb5   : > { %v330_v59 = vpop.permute.xlu1 %329  ;;  %v326_v60 = vpop.permute.xlu0 %325 }
  0xb6   : > { %v336_v4 = vadd.f32 %v326_v60, %v288_v61  ;;  %v337_v6 = vadd.f32 %v326_v60, %v289_v63  ;;  %v338_v14 = vadd.f32 %v330_v59, %v290_v5  ;;  %v339_v24 = vadd.f32 %v330_v59, %v291_v16 }
  0xb8   : > { %v5806_v15 = vmax.f32 %v336_v4, 0.0  ;;  %v5808_v17 = vmax.f32 %v337_v6, 0.0  ;;  %v5813_v25 = vmax.f32 %v338_v14, 0.0  ;;  %v5817_v32 = vmax.f32 %v339_v24, 0.0 }
  0xb9   : > { %v369_v7 = vpop.permute.xlu1 %368  ;;  %v356_v8 = vpop.permute.xlu0 %355 }
  0xba   : > { %v371_v10 = vmul.f32 %v369_v7, %v5795_v2  ;;  %v358_v11 = vmul.f32 %v356_v8, %v5797_v3  ;;  %v372_v18 = vmul.f32 %v369_v7, %v5802_v12  ;;  %v359_v19 = vmul.f32 %v356_v8, %v5804_v13 }
  0xbc   : > { %v373_v22 = vadd.f32 %v371_v10, %v358_v11  ;;  %v374_v28 = vadd.f32 %v372_v18, %v359_v19 }
  0xbd   : > { %v399_v20 = vpop.permute.xlu1 %398  ;;  %v384_v21 = vpop.permute.xlu0 %383 }
  0xbe   : > { %v386_v23 = vmul.f32 %v384_v21, %v5806_v15  ;;  %v387_v26 = vmul.f32 %v384_v21, %v5808_v17  ;;  %v401_v29 = vmul.f32 %v399_v20, %v5813_v25  ;;  %v402_v37 = vmul.f32 %v399_v20, %v5817_v32 }
  0xc0   : > { %v388_v27 = vadd.f32 %v386_v23, %v373_v22  ;;  %v389_v33 = vadd.f32 %v387_v26, %v374_v28 }
  0xc1   : > { %v968_v30 = vpop.permute.xlu1 %967  ;;  %v955_v31 = vpop.permute.xlu0 %954 }
  0xc2   : > { %v403_v34 = vadd.f32 %v401_v29, %v388_v27  ;;  %v970_v35 = vmul.f32 %v968_v30, %v5795_v2  ;;  %v957_v36 = vmul.f32 %v955_v31, %v5797_v3  ;;  %v404_v41 = vadd.f32 %v402_v37, %v389_v33 }
  0xc3   : > { %v971_v42 = vmul.f32 %v968_v30, %v5802_v12  ;;  %v958_v43 = vmul.f32 %v955_v31, %v5804_v13 }
  0xc4   : > { %405 = vxpose.xlu0.b32.start [1/2] (short) (narrow) %v403_v34, 16  ;;  %v972_v44 = vadd.f32 %v970_v35, %v957_v36 }
  0xc5   : > { %v1567_v38 = vpop.permute.xlu1 %1566  ;;  %v983_v39 = vpop.permute.xlu0 %982  ;;  %v973_v50 = vadd.f32 %v971_v42, %v958_v43 }
  0xc6   : > { %v985_v40 = vmul.f32 %v983_v39, %v5806_v15  ;;  %v986_v47 = vmul.f32 %v983_v39, %v5808_v17  ;;  %v1569_v60 = vmul.f32 %v1567_v38, %v5795_v2  ;;  %v1570_v4 = vmul.f32 %v1567_v38, %v5802_v12 }
  0xc8   : > { %406 = vxpose.xlu0.b32.end [2/2] (short) (narrow) %v404_v41, 16  ;;  %v987_v48 = vadd.f32 %v985_v40, %v972_v44  ;;  %v988_v55 = vadd.f32 %v986_v47, %v973_v50 }
  0xc9   : > { %v2166_v45 = vpop.permute.xlu1 %2165  ;;  %v998_v46 = vpop.permute.xlu0 %997 }
  0xca   : > { %v1000_v49 = vmul.f32 %v998_v46, %v5813_v25  ;;  %v1001_v51 = vmul.f32 %v998_v46, %v5817_v32  ;;  %v2168_v24 = vmul.f32 %v2166_v45, %v5795_v2  ;;  %v2169_v34 = vmul.f32 %v2166_v45, %v5802_v12 }
  0xcc   : > { %v1002_v52 = vadd.f32 %v1000_v49, %v987_v48  ;;  %v1003_v56 = vadd.f32 %v1001_v51, %v988_v55 }
  0xcd   : > { %v5828_v53 = vpop.permute.xlu1 %2764  ;;  %v1554_v54 = vpop.permute.xlu0 %1553 }
  0xce   : > { %1004 = vxpose.xlu0.b32.start [1/2] (short) (narrow) %v1002_v52, 16  ;;  %v1556_v57 = vmul.f32 %v1554_v54, %v5797_v3  ;;  %v1557_v62 = vmul.f32 %v1554_v54, %v5804_v13 }
  0xd0   : > { %v1571_v63 = vadd.f32 %v1569_v60, %v1556_v57  ;;  %v1572_v8 = vadd.f32 %v1570_v4, %v1557_v62  ;;  %v2767_v57 = vmul.f32 %v5828_v53, %v5795_v2  ;;  %v2768_v62 = vmul.f32 %v5828_v53, %v5802_v12 }
  0xd1   : > { %v5831_v58 = vpop.permute.xlu1 %3350  ;;  %v1582_v59 = vpop.permute.xlu0 %1581 }
  0xd2   : > { %v1584_v61 = vmul.f32 %v1582_v59, %v5806_v15  ;;  %1005 = vxpose.xlu0.b32.end [2/2] (short) (narrow) %v1003_v56, 16  ;;  %v1585_v5 = vmul.f32 %v1582_v59, %v5808_v17 }
  0xd4   : > { %v1586_v6 = vadd.f32 %v1584_v61, %v1571_v63  ;;  %v1587_v16 = vadd.f32 %v1585_v5, %v1572_v8 }
  0xd5   : > { %v5836_v0 = vpop.permute.xlu1 %3363  ;;  %v1597_v1 = vpop.permute.xlu0 %1596 }
  0xd6   : > { %v1599_v7 = vmul.f32 %v1597_v1, %v5813_v25  ;;  %v1600_v9 = vmul.f32 %v1597_v1, %v5817_v32 }
  0xd8   : > { %v1601_v10 = vadd.f32 %v1599_v7, %v1586_v6  ;;  %v1602_v20 = vadd.f32 %v1600_v9, %v1587_v16  ;;  %v3366_v9 = vmul.f32 %v5836_v0, %v5795_v2 }
  0xd9   : > { %v3950_v11 = vpop.permute.xlu1 %3949  ;;  %v2153_v14 = vpop.permute.xlu0 %2152 }
  0xda   : > { %v3952_v18 = vmul.f32 %v3950_v11, %v5797_v3  ;;  %v3953_v19 = vmul.f32 %v3950_v11, %v5804_v13  ;;  %1603 = vxpose.xlu0.b32.start [1/2] (short) (narrow) %v1601_v10, 16  ;;  %v2155_v21 = vmul.f32 %v2153_v14, %v5797_v3  ;;  %v2156_v29 = vmul.f32 %v2153_v14, %v5804_v13 }
  0xdc   : > { %v2170_v30 = vadd.f32 %v2168_v24, %v2155_v21  ;;  %v2171_v42 = vadd.f32 %v2169_v34, %v2156_v29 }
  0xdd   : > { %v3963_v22 = vpop.permute.xlu1 %3962  ;;  %v2181_v23 = vpop.permute.xlu0 %2180 }
  0xde   : > { %v3965_v26 = vmul.f32 %v3963_v22, %v5795_v2  ;;  %v3966_v27 = vmul.f32 %v3963_v22, %v5802_v12  ;;  %v2183_v28 = vmul.f32 %v2181_v23, %v5806_v15  ;;  %1604 = vxpose.xlu0.b32.end [2/2] (short) (narrow) %v1602_v20, 16  ;;  %v2184_v35 = vmul.f32 %v2181_v23, %v5808_v17 }
  0xe0   : > { %v3967_v31 = vadd.f32 %v3965_v26, %v3952_v18  ;;  %v3968_v33 = vadd.f32 %v3966_v27, %v3953_v19  ;;  %v2185_v38 = vadd.f32 %v2183_v28, %v2170_v30  ;;  %v2186_v48 = vadd.f32 %v2184_v35, %v2171_v42 }
  0xe1   : > { %v4549_v36 = vpop.permute.xlu1 %4548  ;;  %v2196_v37 = vpop.permute.xlu0 %2195  ;;  %v3353_v18 = vmul.f32 %v5831_v58, %v5797_v3 }
  0xe2   : > { %v4551_v39 = vmul.f32 %v4549_v36, %v5797_v3  ;;  %v4552_v40 = vmul.f32 %v4549_v36, %v5804_v13  ;;  %v2198_v41 = vmul.f32 %v2196_v37, %v5813_v25  ;;  %v2199_v43 = vmul.f32 %v2196_v37, %v5817_v32 }
  0xe3   : > { %v3368_v26 = vadd.f32 %v3366_v9, %v3353_v18 }
  0xe4   : > { %v2200_v44 = vadd.f32 %v2198_v41, %v2185_v38  ;;  %v2201_v50 = vadd.f32 %v2199_v43, %v2186_v48  ;;  %v5544_v43 = vmov 1966171168  }
  0xe5   : > { %v4562_v46 = vpop.permute.xlu1 %4561  ;;  %v2752_v47 = vpop.permute.xlu0 %2751 }
  0xe6   : > { %v4564_v45 = vmul.f32 %v4562_v46, %v5795_v2  ;;  %v4565_v49 = vmul.f32 %v4562_v46, %v5802_v12  ;;  %2202 = vxpose.xlu0.b32.start [1/2] (short) (narrow) %v2200_v44, 16  ;;  %v2754_v54 = vmul.f32 %v2752_v47, %v5797_v3  ;;  %v2755_v60 = vmul.f32 %v2752_v47, %v5804_v13 }
  0xe7   : > { %v3367_v2 = vmul.f32 %v5836_v0, %v5802_v12  ;;  %v3354_v3 = vmul.f32 %v5831_v58, %v5804_v13  ;;  %v441_v44 = vunpack.c.l.s4 %v5544_v43  ;;  %v443_v46 = vlaneseq }
  0xe8   : > { %v4566_v51 = vadd.f32 %v4564_v45, %v4551_v39  ;;  %v4567_v52 = vadd.f32 %v4565_v49, %v4552_v40  ;;  %v2769_v61 = vadd.f32 %v2767_v57, %v2754_v54  ;;  %v2770_v10 = vadd.f32 %v2768_v62, %v2755_v60 }
  0xe9   : > { %v3379_v55 = vpop.permute.xlu1 %3378  ;;  %v2780_v56 = vpop.permute.xlu0 %2779  ;;  %v3369_v36 = vadd.f32 %v3367_v2, %v3354_v3  ;;  %v442_v47 = vunpack.c.0.s8 %v441_v44  ;;  %v444_v48 = vshrl.u32 %v443_v46, 7 }
  0xea   : > { %v2782_v59 = vmul.f32 %v2780_v56, %v5806_v15  ;;  %2203 = vxpose.xlu0.b32.end [2/2] (short) (narrow) %v2201_v50, 16  ;;  %v2783_v63 = vmul.f32 %v2780_v56, %v5808_v17  ;;  %v3381_v21 = vmul.f32 %v3379_v55, %v5806_v15 }
  0xeb   : > { %v5896_v45 = vsub.s32 %v442_v47, %v444_v48  ;;  %v5903_v62 = vsub.s32 0, %v444_v48 }
  0xec   : > { %v2784_v5 = vadd.f32 %v2782_v59, %v2769_v61  ;;  %v2785_v22 = vadd.f32 %v2783_v63, %v2770_v10  ;;  %v3383_v34 = vadd.f32 %v3381_v21, %v3368_v26 }
  0xed   : > { %v3978_v1 = vpop.permute.xlu1 %3977  ;;  %v2795_v4 = vpop.permute.xlu0 %2794 }
  0xee   : > { %v3980_v6 = vmul.f32 %v3978_v1, %v5806_v15  ;;  %v3981_v7 = vmul.f32 %v3978_v1, %v5808_v17  ;;  %v2797_v8 = vmul.f32 %v2795_v4, %v5813_v25  ;;  %v2798_v16 = vmul.f32 %v2795_v4, %v5817_v32 }
  0xf0   : > { %v3982_v11 = vadd.f32 %v3980_v6, %v3967_v31  ;;  %v3983_v14 = vadd.f32 %v3981_v7, %v3968_v33  ;;  %v2799_v53 = vadd.f32 %v2797_v8, %v2784_v5  ;;  %v2800_v27 = vadd.f32 %v2798_v16, %v2785_v22 }
  0xf1   : > { %v4577_v19 = vpop.permute.xlu1 %4576  ;;  %v3394_v20 = vpop.permute.xlu0 %3393  ;;  %v3382_v33 = vmul.f32 %v3379_v55, %v5808_v17  ;;  %v5545_v55 = vmov 1983009808  }
  0xf2   : > { %v4579_v23 = vmul.f32 %v4577_v19, %v5806_v15  ;;  %v4580_v24 = vmul.f32 %v4577_v19, %v5808_v17  ;;  %2801 = vxpose.xlu0.b32.start [1/2] (short) (narrow) %v2799_v53, 16  ;;  %v3396_v30 = vmul.f32 %v3394_v20, %v5813_v25  ;;  %v3397_v12 = vmul.f32 %v3394_v20, %v5817_v32 }
  0xf3   : > { %v3384_v40 = vadd.f32 %v3382_v33, %v3369_v36  ;;  %v604_v56 = vunpack.c.l.s4 %v5545_v55 }
  0xf4   : > { %v4581_v28 = vadd.f32 %v4579_v23, %v4566_v51  ;;  %v4582_v29 = vadd.f32 %v4580_v24, %v4567_v52  ;;  %v3398_v0 = vadd.f32 %v3396_v30, %v3383_v34 }
  0xf5   : > { %v3993_v31 = vpop.permute.xlu1 %3992  ;;  %v3399_v58 = vadd.f32 %v3397_v12, %v3384_v40  ;;  %v605_v4 = vunpack.c.0.s8 %v604_v56 }
  0xf6   : > { %v3995_v15 = vmul.f32 %v3993_v31, %v5813_v25  ;;  %v3996_v35 = vmul.f32 %v3993_v31, %v5817_v32  ;;  %2802 = vxpose.xlu0.b32.end [2/2] (short) (narrow) %v2800_v27, 16 }
  0xf7   : > { %v5913_v19 = vsub.s32 %v605_v4, %v444_v48 }
  0xf8   : > { %v5886_v37 = vadd.f32 %v3995_v15, %v3982_v11  ;;  %v5888_v38 = vadd.f32 %v3996_v35, %v3983_v14 }
  0xf9   : > { %v4592_v39 = vpop.permute.xlu1 %4591 }
  0xfa   : > { %v4594_v13 = vmul.f32 %v4592_v39, %v5813_v25  ;;  %v4595_v17 = vmul.f32 %v4592_v39, %v5817_v32  ;;  %3400 = vxpose.xlu0.b32.start [1/2] (short) (narrow) %v3398_v0, 16 }
  0xfc   : > { %v5892_v41 = vadd.f32 %v4594_v13, %v4581_v28  ;;  %v5894_v42 = vadd.f32 %v4595_v17, %v4582_v29 }
  0xfe   : > { %3401 = vxpose.xlu0.b32.end [2/2] (short) (narrow) %v3399_v58, 16 }
 0x140   : > { %v421_v49 = vpop.trf.xlu0 }
 0x141   : > { %v439_v50 = vcombine.high %v421_v49, %v421_v49  ;;  %v446_v25 = vrot.slane %v421_v49, %v5896_v45 }
 0x143   : > { %v453_v32 = vrot.slane %v439_v50, %v5896_v45  ;;  %v454_v51 = vcombine.high %v446_v25, %v446_v25  ;;  %v462_v59 = vrot.slane %v446_v25, %v5896_v45 }
 0x144   : > { %v422_v52 = vpop.trf.xlu0 }
 0x145   : > { %v476_v54 = vrot.slane %v454_v51, %v5896_v45  ;;  %v455_v57 = vcombine.high %v453_v32, %v453_v32  ;;  %v488_v60 = vcombine.high %v422_v52, %v422_v52  ;;  %v495_v61 = vrot.slane %v422_v52, %v5896_v45 }
 0x146   : > { %v484_v6 = vcombine.high %v462_v59, %v462_v59  ;;  %v469_v14 = vrot.slane %v453_v32, %v5896_v45  ;;  %v540_v16 = vrot.slane %v462_v59, %v5903_v62 }
 0x147   : > { %v486_v63 = vcombine.high %v476_v54, %v476_v54  ;;  %v503_v1 = vcombine.high %v495_v61, %v495_v61  ;;  %v483_v5 = vrot.slane %v455_v57, %v5896_v45  ;;  %v544_v7 = vrot.slane %v476_v54, %v5903_v62 }
 0x148   : > { %v502_v8 = vrot.slane %v488_v60, %v5896_v45  ;;  %v511_v10 = vrot.slane %v495_v61, %v5896_v45  ;;  %v548_v21 = vrot.slane %v484_v6, %v5903_v62  ;;  %v485_v26 = vcombine.high %v469_v14, %v469_v14 }
 0x149   : > { %v525_v11 = vrot.slane %v503_v1, %v5896_v45  ;;  %v552_v53 = vrot.slane %v486_v63, %v5903_v62  ;;  %v487_v20 = vcombine.high %v483_v5, %v483_v5  ;;  %v601_v22 = vcombine.low %v540_v16, %v544_v7 }
 0x14a   : > { %v1020_v9 = vpop.trf.xlu0  ;;  %v504_v23 = vcombine.high %v502_v8, %v502_v8  ;;  %v533_v24 = vcombine.high %v511_v10, %v511_v10  ;;  %v556_v29 = vrot.slane %v469_v14, %v5903_v62  ;;  %v560_v30 = vrot.slane %v483_v5, %v5903_v62 }
 0x14b   : > { %v1038_v18 = vcombine.high %v1020_v9, %v1020_v9  ;;  %v535_v2 = vcombine.high %v525_v11, %v525_v11  ;;  %v1045_v27 = vrot.slane %v1020_v9, %v5896_v45  ;;  %v602_v28 = vcombine.low %v548_v21, %v552_v53 }
 0x14c   : > { %v518_v3 = vrot.slane %v502_v8, %v5896_v45  ;;  %v568_v33 = vrot.slane %v487_v20, %v5903_v62  ;;  %v532_v34 = vrot.slane %v504_v23, %v5896_v45  ;;  %v609_v15 = vrot.slane %v601_v22, %v5913_v19 }
 0x14d   : > { %v1052_v31 = vrot.slane %v1038_v18, %v5896_v45  ;;  %v616_v35 = vrot.slane %v602_v28, %v5913_v19  ;;  %v572_v36 = vrot.slane %v511_v10, %v5903_v62  ;;  %v576_v12 = vrot.slane %v525_v11, %v5903_v62 }
 0x14e   : > { %v580_v0 = vrot.slane %v533_v24, %v5903_v62  ;;  %v584_v39 = vrot.slane %v535_v2, %v5903_v62  ;;  %v1021_v40 = vpop.trf.xlu0  ;;  %v564_v13 = vrot.slane %v485_v26, %v5903_v62  ;;  %v1053_v17 = vcombine.high %v1045_v27, %v1045_v27 }
 0x14f   : > { %v617_v58 = vcombine.low %v609_v15, %v616_v35  ;;  %v618_v43 = vcombine.low %v556_v29, %v560_v30  ;;  %v534_v44 = vcombine.high %v518_v3, %v518_v3  ;;  %v1054_v46 = vcombine.high %v1052_v31, %v1052_v31 }
 0x150   : > { %v536_v47 = vcombine.high %v532_v34, %v532_v34  ;;  %v1061_v48 = vrot.slane %v1045_v27, %v5896_v45  ;;  %v1094_v49 = vrot.slane %v1021_v40, %v5896_v45  ;;  %v619_v50 = vcombine.low %v564_v13, %v568_v33 }
 0x151   : > { %673 = vxpose.xlu1.b32.start [1/4] (short) (narrow) %v617_v58, 16  ;;  %v635_v25 = vcombine.low %v572_v36, %v576_v12  ;;  %v636_v32 = vcombine.low %v580_v0, %v584_v39  ;;  %v588_v51 = vrot.slane %v518_v3, %v5903_v62  ;;  %v1068_v52 = vrot.slane %v1052_v31, %v5896_v45 }
 0x152   : > { %v1075_v54 = vrot.slane %v1053_v17, %v5896_v45  ;;  %v1102_v55 = vcombine.high %v1094_v49, %v1094_v49  ;;  %v1082_v56 = vrot.slane %v1054_v46, %v5896_v45  ;;  %v1087_v57 = vcombine.high %v1021_v40, %v1021_v40 }
 0x153   : > { %v626_v59 = vrot.slane %v618_v43, %v5913_v19  ;;  %v633_v60 = vrot.slane %v619_v50, %v5913_v19  ;;  %v592_v61 = vrot.slane %v532_v34, %v5903_v62  ;;  %v596_v63 = vrot.slane %v534_v44, %v5903_v62 }
 0x154   : > { %v600_v1 = vrot.slane %v536_v47, %v5903_v62  ;;  %v1083_v4 = vcombine.high %v1061_v48, %v1061_v48  ;;  %v1110_v6 = vrot.slane %v1094_v49, %v5896_v45  ;;  %v643_v8 = vrot.slane %v635_v25, %v5913_v19 }
 0x155   : > { %v634_v7 = vcombine.low %v626_v59, %v633_v60  ;;  %v650_v9 = vrot.slane %v636_v32, %v5913_v19  ;;  %v1085_v10 = vcombine.high %v1075_v54, %v1075_v54  ;;  %v1139_v11 = vrot.slane %v1061_v48, %v5903_v62 }
 0x156   : > { %v1619_v5 = vpop.trf.xlu0  ;;  %v1143_v14 = vrot.slane %v1075_v54, %v5903_v62  ;;  %v1124_v16 = vrot.slane %v1102_v55, %v5896_v45  ;;  %v1084_v53 = vcombine.high %v1068_v52, %v1068_v52  ;;  %v1086_v18 = vcombine.high %v1082_v56, %v1082_v56 }
 0x157   : > { %v1101_v20 = vrot.slane %v1087_v57, %v5896_v45  ;;  %674 = vxpose.xlu1.b32.cont [2/4] (short) (narrow) %v634_v7, 16  ;;  %v1637_v21 = vcombine.high %v1619_v5, %v1619_v5  ;;  %v652_v22 = vcombine.low %v588_v51, %v592_v61  ;;  %v1155_v23 = vrot.slane %v1068_v52, %v5903_v62 }
 0x158   : > { %v1159_v24 = vrot.slane %v1082_v56, %v5903_v62  ;;  %v1147_v2 = vrot.slane %v1083_v4, %v5903_v62  ;;  %v1132_v26 = vcombine.high %v1110_v6, %v1110_v6  ;;  %v651_v27 = vcombine.low %v643_v8, %v650_v9 }
 0x159   : > { %v1644_v28 = vrot.slane %v1619_v5, %v5896_v45  ;;  %v1151_v29 = vrot.slane %v1085_v10, %v5903_v62  ;;  %v1200_v30 = vcombine.low %v1139_v11, %v1143_v14  ;;  %v1134_v3 = vcombine.high %v1124_v16, %v1124_v16 }
 0x15a   : > { %v653_v31 = vcombine.low %v596_v63, %v600_v1  ;;  %v1163_v33 = vrot.slane %v1084_v53, %v5903_v62  ;;  %v1167_v34 = vrot.slane %v1086_v18, %v5903_v62  ;;  %v1103_v15 = vcombine.high %v1101_v20, %v1101_v20  ;;  %v1620_v40 = vpop.trf.xlu0 }
 0x15b   : > { %675 = vxpose.xlu1.b32.cont [3/4] (short) (narrow) %v651_v27, 16  ;;  %v1651_v35 = vrot.slane %v1637_v21, %v5896_v45  ;;  %v1217_v36 = vcombine.low %v1155_v23, %v1159_v24  ;;  %v1117_v12 = vrot.slane %v1101_v20, %v5896_v45  ;;  %v660_v0 = vrot.slane %v652_v22, %v5913_v19 }
 0x15c   : > { %v667_v39 = vrot.slane %v653_v31, %v5913_v19  ;;  %v1171_v13 = vrot.slane %v1110_v6, %v5903_v62  ;;  %v1175_v17 = vrot.slane %v1124_v16, %v5903_v62  ;;  %v1179_v58 = vrot.slane %v1132_v26, %v5903_v62 }
 0x15d   : > { %v1652_v43 = vcombine.high %v1644_v28, %v1644_v28  ;;  %v1183_v44 = vrot.slane %v1134_v3, %v5903_v62  ;;  %v1201_v47 = vcombine.low %v1147_v2, %v1151_v29  ;;  %v1208_v48 = vrot.slane %v1200_v30, %v5913_v19 }
 0x15e   : > { %v668_v46 = vcombine.low %v660_v0, %v667_v39  ;;  %v1131_v49 = vrot.slane %v1103_v15, %v5896_v45  ;;  %v1653_v50 = vcombine.high %v1651_v35, %v1651_v35  ;;  %v1686_v25 = vcombine.high %v1620_v40, %v1620_v40 }
 0x15f   : > { %v1693_v32 = vrot.slane %v1620_v40, %v5896_v45  ;;  %v1660_v51 = vrot.slane %v1644_v28, %v5896_v45  ;;  %v1667_v52 = vrot.slane %v1651_v35, %v5896_v45  ;;  %v1215_v54 = vrot.slane %v1201_v47, %v5913_v19 }
 0x160   : > { %676 = vxpose.xlu1.b32.end [4/4] (short) (narrow) %v668_v46, 16  ;;  %v1218_v55 = vcombine.low %v1163_v33, %v1167_v34  ;;  %v1133_v56 = vcombine.high %v1117_v12, %v1117_v12  ;;  %v1187_v57 = vrot.slane %v1117_v12, %v5903_v62  ;;  %v1234_v59 = vcombine.low %v1171_v13, %v1175_v17 }
 0x161   : > { %v1674_v60 = vrot.slane %v1652_v43, %v5896_v45  ;;  %v1235_v61 = vcombine.low %v1179_v58, %v1183_v44  ;;  %v1216_v63 = vcombine.low %v1208_v48, %v1215_v54  ;;  %v1225_v1 = vrot.slane %v1217_v36, %v5913_v19 }
 0x162   : > { %v1232_v4 = vrot.slane %v1218_v55, %v5913_v19  ;;  %v1135_v5 = vcombine.high %v1131_v49, %v1131_v49  ;;  %v1681_v6 = vrot.slane %v1653_v50, %v5896_v45  ;;  %v1700_v7 = vrot.slane %v1686_v25, %v5896_v45  ;;  %v2218_v9 = vpop.trf.xlu0 }
 0x163   : > { %v1701_v8 = vcombine.high %v1693_v32, %v1693_v32  ;;  %v1191_v10 = vrot.slane %v1131_v49, %v5903_v62  ;;  %v1682_v11 = vcombine.high %v1660_v51, %v1660_v51  ;;  %v1683_v14 = vcombine.high %v1667_v52, %v1667_v52 }
 0x164   : > { %v1738_v16 = vrot.slane %v1660_v51, %v5903_v62  ;;  %1272 = vxpose.xlu1.b32.start [1/4] (short) (narrow) %v1216_v63, 16  ;;  %v1684_v53 = vcombine.high %v1674_v60, %v1674_v60  ;;  %v1742_v18 = vrot.slane %v1674_v60, %v5903_v62  ;;  %v1754_v20 = vrot.slane %v1667_v52, %v5903_v62 }
 0x165   : > { %v1709_v21 = vrot.slane %v1693_v32, %v5896_v45  ;;  %v1233_v22 = vcombine.low %v1225_v1, %v1232_v4  ;;  %v1242_v23 = vrot.slane %v1234_v59, %v5913_v19  ;;  %v1249_v24 = vrot.slane %v1235_v61, %v5913_v19 }
 0x166   : > { %v2236_v2 = vcombine.high %v2218_v9, %v2218_v9  ;;  %v1685_v26 = vcombine.high %v1681_v6, %v1681_v6  ;;  %v1758_v27 = vrot.slane %v1681_v6, %v5903_v62  ;;  %v1702_v28 = vcombine.high %v1700_v7, %v1700_v7  ;;  %v2219_v44 = vpop.trf.xlu0 }
 0x167   : > { %v1723_v29 = vrot.slane %v1701_v8, %v5896_v45  ;;  %v1195_v30 = vrot.slane %v1133_v56, %v5903_v62  ;;  %v1199_v3 = vrot.slane %v1135_v5, %v5903_v62  ;;  %v1251_v31 = vcombine.low %v1187_v57, %v1191_v10 }
 0x168   : > { %v1716_v33 = vrot.slane %v1700_v7, %v5896_v45  ;;  %1273 = vxpose.xlu1.b32.cont [2/4] (short) (narrow) %v1233_v22, 16  ;;  %v1746_v34 = vrot.slane %v1682_v11, %v5903_v62  ;;  %v1750_v15 = vrot.slane %v1684_v53, %v5903_v62  ;;  %v1731_v35 = vcombine.high %v1709_v21, %v1709_v21 }
 0x169   : > { %v2243_v36 = vrot.slane %v2218_v9, %v5896_v45  ;;  %v1762_v12 = vrot.slane %v1683_v14, %v5903_v62  ;;  %v1799_v0 = vcombine.low %v1738_v16, %v1742_v18  ;;  %v1250_v39 = vcombine.low %v1242_v23, %v1249_v24 }
 0x16a   : > { %v2250_v40 = vrot.slane %v2236_v2, %v5896_v45  ;;  %v1766_v13 = vrot.slane %v1685_v26, %v5903_v62  ;;  %v1816_v17 = vcombine.low %v1754_v20, %v1758_v27  ;;  %v1730_v58 = vrot.slane %v1702_v28, %v5896_v45 }
 0x16b   : > { %v1733_v43 = vcombine.high %v1723_v29, %v1723_v29  ;;  %v1732_v46 = vcombine.high %v1716_v33, %v1716_v33  ;;  %v1770_v47 = vrot.slane %v1709_v21, %v5903_v62  ;;  %v1774_v48 = vrot.slane %v1723_v29, %v5903_v62 }
 0x16c   : > { %1274 = vxpose.xlu1.b32.cont [3/4] (short) (narrow) %v1250_v39, 16  ;;  %v1252_v49 = vcombine.low %v1195_v30, %v1199_v3  ;;  %v1778_v50 = vrot.slane %v1731_v35, %v5903_v62  ;;  %v1786_v25 = vrot.slane %v1716_v33, %v5903_v62  ;;  %v2251_v32 = vcombine.high %v2243_v36, %v2243_v36 }
 0x16d   : > { %v1259_v51 = vrot.slane %v1251_v31, %v5913_v19  ;;  %v2252_v52 = vcombine.high %v2250_v40, %v2250_v40  ;;  %v1800_v55 = vcombine.low %v1746_v34, %v1750_v15  ;;  %v2285_v56 = vcombine.high %v2219_v44, %v2219_v44 }
 0x16e   : > { %v1266_v54 = vrot.slane %v1252_v49, %v5913_v19  ;;  %v1734_v57 = vcombine.high %v1730_v58, %v1730_v58  ;;  %v1782_v59 = vrot.slane %v1733_v43, %v5903_v62  ;;  %v1790_v60 = vrot.slane %v1730_v58, %v5903_v62  ;;  %v2817_v20 = vpop.trf.xlu0 }
 0x16f   : > { %v2292_v61 = vrot.slane %v2219_v44, %v5896_v45  ;;  %v1807_v1 = vrot.slane %v1799_v0, %v5913_v19  ;;  %v1814_v4 = vrot.slane %v1800_v55, %v5913_v19  ;;  %v1817_v5 = vcombine.low %v1762_v12, %v1766_v13 }
 0x170   : > { %v1267_v63 = vcombine.low %v1259_v51, %v1266_v54  ;;  %v2259_v6 = vrot.slane %v2243_v36, %v5896_v45  ;;  %v2266_v7 = vrot.slane %v2250_v40, %v5896_v45  ;;  %v2273_v8 = vrot.slane %v2251_v32, %v5896_v45 }
 0x171   : > { %v1794_v9 = vrot.slane %v1732_v46, %v5903_v62  ;;  %v2280_v10 = vrot.slane %v2252_v52, %v5896_v45  ;;  %v2299_v11 = vrot.slane %v2285_v56, %v5896_v45  ;;  %v1798_v14 = vrot.slane %v1734_v57, %v5903_v62 }
 0x172   : > { %1275 = vxpose.xlu1.b32.end [4/4] (short) (narrow) %v1267_v63, 16  ;;  %v1833_v16 = vcombine.low %v1770_v47, %v1774_v48  ;;  %v1834_v53 = vcombine.low %v1778_v50, %v1782_v59  ;;  %v2300_v18 = vcombine.high %v2292_v61, %v2292_v61  ;;  %v1850_v21 = vcombine.low %v1786_v25, %v1790_v60  ;;  %v2818_v55 = vpop.trf.xlu0 }
 0x173   : > { %v1815_v22 = vcombine.low %v1807_v1, %v1814_v4  ;;  %v1824_v23 = vrot.slane %v1816_v17, %v5913_v19  ;;  %v1831_v24 = vrot.slane %v1817_v5, %v5913_v19  ;;  %v2281_v2 = vcombine.high %v2259_v6, %v2259_v6 }
 0x174   : > { %v2282_v26 = vcombine.high %v2266_v7, %v2266_v7  ;;  %v2283_v27 = vcombine.high %v2273_v8, %v2273_v8  ;;  %v2337_v28 = vrot.slane %v2259_v6, %v5903_v62  ;;  %v2284_v29 = vcombine.high %v2280_v10, %v2280_v10 }
 0x175   : > { %v2301_v30 = vcombine.high %v2299_v11, %v2299_v11  ;;  %v2308_v3 = vrot.slane %v2292_v61, %v5896_v45  ;;  %v2835_v31 = vcombine.high %v2817_v20, %v2817_v20  ;;  %v2341_v33 = vrot.slane %v2273_v8, %v5903_v62 }
 0x176   : > { %1871 = vxpose.xlu1.b32.start [1/4] (short) (narrow) %v1815_v22, 16  ;;  %v2353_v34 = vrot.slane %v2266_v7, %v5903_v62  ;;  %v2322_v15 = vrot.slane %v2300_v18, %v5896_v45  ;;  %v2842_v35 = vrot.slane %v2817_v20, %v5896_v45  ;;  %v2357_v36 = vrot.slane %v2280_v10, %v5903_v62 }
 0x177   : > { %v1832_v12 = vcombine.low %v1824_v23, %v1831_v24  ;;  %v1841_v0 = vrot.slane %v1833_v16, %v5913_v19  ;;  %v1848_v39 = vrot.slane %v1834_v53, %v5913_v19  ;;  %v2345_v40 = vrot.slane %v2281_v2, %v5903_v62 }
 0x178   : > { %v2349_v13 = vrot.slane %v2283_v27, %v5903_v62  ;;  %v2361_v17 = vrot.slane %v2282_v26, %v5903_v62  ;;  %v2315_v58 = vrot.slane %v2299_v11, %v5896_v45  ;;  %v2365_v43 = vrot.slane %v2284_v29, %v5903_v62 }
 0x179   : > { %v2329_v44 = vrot.slane %v2301_v30, %v5896_v45  ;;  %v2330_v46 = vcombine.high %v2308_v3, %v2308_v3  ;;  %v2849_v47 = vrot.slane %v2835_v31, %v5896_v45  ;;  %v2398_v48 = vcombine.low %v2337_v28, %v2341_v33 }
 0x17a   : > { %1872 = vxpose.xlu1.b32.cont [2/4] (short) (narrow) %v1832_v12, 16  ;;  %v2332_v49 = vcombine.high %v2322_v15, %v2322_v15  ;;  %v2850_v50 = vcombine.high %v2842_v35, %v2842_v35  ;;  %v1851_v25 = vcombine.low %v1794_v9, %v1798_v14  ;;  %v2415_v32 = vcombine.low %v2353_v34, %v2357_v36 }
 0x17b   : > { %v2369_v51 = vrot.slane %v2308_v3, %v5903_v62  ;;  %v1849_v52 = vcombine.low %v1841_v0, %v1848_v39  ;;  %v1858_v54 = vrot.slane %v1850_v21, %v5913_v19  ;;  %v2331_v56 = vcombine.high %v2315_v58, %v2315_v58 }
 0x17c   : > { %v2373_v57 = vrot.slane %v2322_v15, %v5903_v62  ;;  %v1865_v59 = vrot.slane %v1851_v25, %v5913_v19  ;;  %v2399_v60 = vcombine.low %v2345_v40, %v2349_v13  ;;  %v2333_v61 = vcombine.high %v2329_v44, %v2329_v44 }
 0x17d   : > { %v2377_v63 = vrot.slane %v2330_v46, %v5903_v62  ;;  %v2851_v1 = vcombine.high %v2849_v47, %v2849_v47  ;;  %v2858_v4 = vrot.slane %v2842_v35, %v5896_v45  ;;  %v2381_v5 = vrot.slane %v2332_v49, %v5903_v62 }
 0x17e   : > { %1873 = vxpose.xlu1.b32.cont [3/4] (short) (narrow) %v1849_v52, 16  ;;  %v2872_v6 = vrot.slane %v2850_v50, %v5896_v45  ;;  %v2406_v7 = vrot.slane %v2398_v48, %v5913_v19  ;;  %v2884_v8 = vcombine.high %v2818_v55, %v2818_v55  ;;  %v1866_v9 = vcombine.low %v1858_v54, %v1865_v59 }
 0x17f   : > { %v2413_v10 = vrot.slane %v2399_v60, %v5913_v19  ;;  %v2891_v11 = vrot.slane %v2818_v55, %v5896_v45  ;;  %v2416_v14 = vcombine.low %v2361_v17, %v2365_v43  ;;  %v2385_v16 = vrot.slane %v2315_v58, %v5903_v62 }
 0x180   : > { %v2389_v53 = vrot.slane %v2329_v44, %v5903_v62  ;;  %v2393_v18 = vrot.slane %v2331_v56, %v5903_v62  ;;  %v2432_v20 = vcombine.low %v2369_v51, %v2373_v57  ;;  %v2865_v21 = vrot.slane %v2849_v47, %v5896_v45 }
 0x181   : > { %v2879_v22 = vrot.slane %v2851_v1, %v5896_v45  ;;  %v2880_v23 = vcombine.high %v2858_v4, %v2858_v4  ;;  %v2397_v24 = vrot.slane %v2333_v61, %v5903_v62  ;;  %v2433_v2 = vcombine.low %v2377_v63, %v2381_v5 }
 0x182   : > { %1874 = vxpose.xlu1.b32.end [4/4] (short) (narrow) %v1866_v9, 16  ;;  %v2882_v26 = vcombine.high %v2872_v6, %v2872_v6  ;;  %v2898_v27 = vrot.slane %v2884_v8, %v5896_v45  ;;  %v2414_v28 = vcombine.low %v2406_v7, %v2413_v10  ;;  %v2899_v29 = vcombine.high %v2891_v11, %v2891_v11 }
 0x183   : > { %v2423_v30 = vrot.slane %v2415_v32, %v5913_v19  ;;  %v2430_v3 = vrot.slane %v2416_v14, %v5913_v19  ;;  %v2449_v31 = vcombine.low %v2385_v16, %v2389_v53  ;;  %v2936_v33 = vrot.slane %v2858_v4, %v5903_v62 }
 0x184   : > { %v2881_v34 = vcombine.high %v2865_v21, %v2865_v21  ;;  %v2883_v15 = vcombine.high %v2879_v22, %v2879_v22  ;;  %v2940_v35 = vrot.slane %v2872_v6, %v5903_v62  ;;  %v2944_v36 = vrot.slane %v2880_v23, %v5903_v62 }
 0x185   : > { %v2948_v12 = vrot.slane %v2882_v26, %v5903_v62  ;;  %v2900_v0 = vcombine.high %v2898_v27, %v2898_v27  ;;  %v2907_v39 = vrot.slane %v2891_v11, %v5896_v45  ;;  %v2450_v40 = vcombine.low %v2393_v18, %v2397_v24 }
 0x186   : > { %2470 = vxpose.xlu1.b32.start [1/4] (short) (narrow) %v2414_v28, 16  ;;  %v2921_v13 = vrot.slane %v2899_v29, %v5896_v45  ;;  %v2431_v17 = vcombine.low %v2423_v30, %v2430_v3  ;;  %v2440_v58 = vrot.slane %v2432_v20, %v5913_v19  ;;  %v2447_v43 = vrot.slane %v2433_v2, %v5913_v19 }
 0x187   : > { %v2952_v44 = vrot.slane %v2865_v21, %v5903_v62  ;;  %v2956_v46 = vrot.slane %v2879_v22, %v5903_v62  ;;  %v2960_v47 = vrot.slane %v2881_v34, %v5903_v62  ;;  %v2997_v48 = vcombine.low %v2936_v33, %v2940_v35 }
 0x188   : > { %v2914_v49 = vrot.slane %v2898_v27, %v5896_v45  ;;  %v2928_v50 = vrot.slane %v2900_v0, %v5896_v45  ;;  %v2929_v25 = vcombine.high %v2907_v39, %v2907_v39  ;;  %v2457_v32 = vrot.slane %v2449_v31, %v5913_v19  ;;  %v3416_v27 = vpop.trf.xlu0 }
 0x189   : > { %v2464_v51 = vrot.slane %v2450_v40, %v5913_v19  ;;  %v2964_v52 = vrot.slane %v2883_v15, %v5903_v62  ;;  %v2931_v54 = vcombine.high %v2921_v13, %v2921_v13  ;;  %v2448_v55 = vcombine.low %v2440_v58, %v2447_v43 }
 0x18a   : > { %2471 = vxpose.xlu1.b32.cont [2/4] (short) (narrow) %v2431_v17, 16  ;;  %v2998_v56 = vcombine.low %v2944_v36, %v2948_v12  ;;  %v3014_v57 = vcombine.low %v2952_v44, %v2956_v46  ;;  %v2930_v59 = vcombine.high %v2914_v49, %v2914_v49  ;;  %v2968_v60 = vrot.slane %v2907_v39, %v5903_v62 }
 0x18b   : > { %v2932_v61 = vcombine.high %v2928_v50, %v2928_v50  ;;  %v2972_v63 = vrot.slane %v2921_v13, %v5903_v62  ;;  %v2976_v1 = vrot.slane %v2929_v25, %v5903_v62  ;;  %v2465_v4 = vcombine.low %v2457_v32, %v2464_v51 }
 0x18c   : > { %v2980_v5 = vrot.slane %v2931_v54, %v5903_v62  ;;  %v3005_v6 = vrot.slane %v2997_v48, %v5913_v19  ;;  %v3012_v7 = vrot.slane %v2998_v56, %v5913_v19  ;;  %v3015_v8 = vcombine.low %v2960_v47, %v2964_v52  ;;  %v3417_v47 = vpop.trf.xlu0 }
 0x18d   : > { %v2984_v9 = vrot.slane %v2914_v49, %v5903_v62  ;;  %v2988_v10 = vrot.slane %v2928_v50, %v5903_v62  ;;  %v2992_v11 = vrot.slane %v2930_v59, %v5903_v62  ;;  %v2996_v14 = vrot.slane %v2932_v61, %v5903_v62 }
 0x18e   : > { %2472 = vxpose.xlu1.b32.cont [3/4] (short) (narrow) %v2448_v55, 16  ;;  %v3031_v16 = vcombine.low %v2968_v60, %v2972_v63  ;;  %v3032_v53 = vcombine.low %v2976_v1, %v2980_v5  ;;  %v3013_v18 = vcombine.low %v3005_v6, %v3012_v7  ;;  %v3022_v20 = vrot.slane %v3014_v57, %v5913_v19 }
 0x18f   : > { %v3029_v21 = vrot.slane %v3015_v8, %v5913_v19  ;;  %v3048_v22 = vcombine.low %v2984_v9, %v2988_v10  ;;  %v3049_v26 = vcombine.low %v2992_v11, %v2996_v14  ;;  %v3434_v28 = vcombine.high %v3416_v27, %v3416_v27 }
 0x190   : > { %v3039_v24 = vrot.slane %v3031_v16, %v5913_v19  ;;  %v3046_v2 = vrot.slane %v3032_v53, %v5913_v19  ;;  %v3441_v29 = vrot.slane %v3416_v27, %v5896_v45  ;;  %v3490_v32 = vrot.slane %v3417_v47, %v5896_v45 }
 0x191   : > { %v3030_v23 = vcombine.low %v3022_v20, %v3029_v21  ;;  %v3056_v3 = vrot.slane %v3048_v22, %v5913_v19  ;;  %v3063_v31 = vrot.slane %v3049_v26, %v5913_v19  ;;  %v3448_v33 = vrot.slane %v3434_v28, %v5896_v45 }
 0x192   : > { %2473 = vxpose.xlu1.b32.end [4/4] (short) (narrow) %v2465_v4, 16  ;;  %v3047_v30 = vcombine.low %v3039_v24, %v3046_v2  ;;  %v3449_v34 = vcombine.high %v3441_v29, %v3441_v29  ;;  %v3457_v15 = vrot.slane %v3441_v29, %v5896_v45  ;;  %v3483_v54 = vcombine.high %v3417_v47, %v3417_v47 }
 0x193   : > { %v3450_v35 = vcombine.high %v3448_v33, %v3448_v33  ;;  %v3464_v36 = vrot.slane %v3448_v33, %v5896_v45  ;;  %v3064_v39 = vcombine.low %v3056_v3, %v3063_v31  ;;  %v3498_v57 = vcombine.high %v3490_v32, %v3490_v32 }
 0x194   : > { %v3471_v12 = vrot.slane %v3449_v34, %v5896_v45  ;;  %v3479_v0 = vcombine.high %v3457_v15, %v3457_v15  ;;  %v3535_v40 = vrot.slane %v3457_v15, %v5903_v62  ;;  %v3497_v59 = vrot.slane %v3483_v54, %v5896_v45 }
 0x195   : > { %v3478_v13 = vrot.slane %v3450_v35, %v5896_v45  ;;  %v3480_v17 = vcombine.high %v3464_v36, %v3464_v36  ;;  %v3551_v46 = vrot.slane %v3464_v36, %v5903_v62  ;;  %v3506_v60 = vrot.slane %v3490_v32, %v5896_v45 }
 0x196   : > { %3069 = vxpose.xlu1.b32.start [1/4] (short) (narrow) %v3013_v18, 16  ;;  %v3481_v58 = vcombine.high %v3471_v12, %v3471_v12  ;;  %v3539_v43 = vrot.slane %v3471_v12, %v5903_v62  ;;  %v3543_v44 = vrot.slane %v3479_v0, %v5903_v62  ;;  %v3520_v1 = vrot.slane %v3498_v57, %v5896_v45 }
 0x197   : > { %v3482_v48 = vcombine.high %v3478_v13, %v3478_v13  ;;  %v3555_v50 = vrot.slane %v3478_v13, %v5903_v62  ;;  %v3559_v51 = vrot.slane %v3480_v17, %v5903_v62  ;;  %v3499_v4 = vcombine.high %v3497_v59, %v3497_v59 }
 0x198   : > { %v3547_v49 = vrot.slane %v3481_v58, %v5903_v62  ;;  %v3596_v25 = vcombine.low %v3535_v40, %v3539_v43  ;;  %v3528_v5 = vcombine.high %v3506_v60, %v3506_v60  ;;  %v3530_v8 = vcombine.high %v3520_v1, %v3520_v1 }
 0x199   : > { %v3563_v52 = vrot.slane %v3482_v48, %v5903_v62  ;;  %v3613_v56 = vcombine.low %v3551_v46, %v3555_v50  ;;  %v3567_v9 = vrot.slane %v3506_v60, %v5903_v62  ;;  %v3571_v10 = vrot.slane %v3520_v1, %v5903_v62 }
 0x19a   : > { %3070 = vxpose.xlu1.b32.cont [2/4] (short) (narrow) %v3030_v23, 16  ;;  %v3597_v55 = vcombine.low %v3543_v44, %v3547_v49  ;;  %v3604_v61 = vrot.slane %v3596_v25, %v5913_v19  ;;  %v3527_v11 = vrot.slane %v3499_v4, %v5896_v45  ;;  %v3575_v14 = vrot.slane %v3528_v5, %v5903_v62 }
 0x19b   : > { %v3614_v7 = vcombine.low %v3559_v51, %v3563_v52  ;;  %v3621_v16 = vrot.slane %v3613_v56, %v5913_v19  ;;  %v3579_v20 = vrot.slane %v3530_v8, %v5903_v62  ;;  %v3630_v21 = vcombine.low %v3567_v9, %v3571_v10 }
 0x19c   : > { %v3611_v63 = vrot.slane %v3597_v55, %v5913_v19  ;;  %v3531_v22 = vcombine.high %v3527_v11, %v3527_v11  ;;  %v3587_v23 = vrot.slane %v3527_v11, %v5903_v62 }
 0x19d   : > { %v3628_v53 = vrot.slane %v3614_v7, %v5913_v19  ;;  %v3631_v26 = vcombine.low %v3575_v14, %v3579_v20  ;;  %v3638_v28 = vrot.slane %v3630_v21, %v5913_v19 }
 0x19e   : > { %3071 = vxpose.xlu1.b32.cont [3/4] (short) (narrow) %v3047_v30, 16  ;;  %v3612_v6 = vcombine.low %v3604_v61, %v3611_v63  ;;  %v3595_v27 = vrot.slane %v3531_v22, %v5903_v62 }
 0x19f   : > { %v3629_v24 = vcombine.low %v3621_v16, %v3628_v53  ;;  %v3645_v30 = vrot.slane %v3631_v26, %v5913_v19 }
 0x1a0   : > { %3668 = vxpose.xlu0.b32.start [1/4] (short) (narrow) %v3612_v6, 16 }
 0x1a1   : > { %v3646_v3 = vcombine.low %v3638_v28, %v3645_v30 }
 0x1a2   : > { %3072 = vxpose.xlu1.b32.end [4/4] (short) (narrow) %v3064_v39, 16 }
 0x1a4   : > { %3669 = vxpose.xlu0.b32.cont [2/4] (short) (narrow) %v3629_v24, 16 }
 0x1a6   : > { %3999 = vxpose.xlu1.b32.start [1/2] (short) (narrow) %v5886_v37, 16  ;;  %v3513_v37 = vrot.slane %v3497_v59, %v5896_v45 }
 0x1a8   : > { %v3529_v18 = vcombine.high %v3513_v37, %v3513_v37  ;;  %3670 = vxpose.xlu0.b32.cont [3/4] (short) (narrow) %v3646_v3, 16 }
 0x1aa   : > { %4000 = vxpose.xlu1.b32.end [2/2] (short) (narrow) %v5888_v38, 16  ;;  %v3583_v38 = vrot.slane %v3513_v37, %v5903_v62  ;;  %v3591_v2 = vrot.slane %v3529_v18, %v5903_v62 }
 0x1ac   : > { %v3647_v29 = vcombine.low %v3583_v38, %v3587_v23  ;;  %v3648_v31 = vcombine.low %v3591_v2, %v3595_v27 }
 0x1ae   : > { %4598 = vxpose.xlu1.b32.start [1/2] (short) (narrow) %v5892_v41, 16  ;;  %v3655_v33 = vrot.slane %v3647_v29, %v5913_v19  ;;  %v3662_v41 = vrot.slane %v3648_v31, %v5913_v19 }
 0x1b0   : > { %v3663_v34 = vcombine.low %v3655_v33, %v3662_v41 }
 0x1b2   : > { %4599 = vxpose.xlu1.b32.end [2/2] (short) (narrow) %v5894_v42, 16  ;;  %3671 = vxpose.xlu0.b32.end [4/4] (short) (narrow) %v3663_v34, 16 }
 0x1d0   : > { %v689_v15 = vpop.trf.xlu1 }
 0x1d1   : > { %v707_v35 = vcombine.high %v689_v15, %v689_v15  ;;  %v714_v36 = vrot.slane %v689_v15, %v5896_v45 }
 0x1d3   : > { %v721_v12 = vrot.slane %v707_v35, %v5896_v45  ;;  %v722_v0 = vcombine.high %v714_v36, %v714_v36  ;;  %v730_v39 = vrot.slane %v714_v36, %v5896_v45 }
 0x1d4   : > { %v690_v40 = vpop.trf.xlu1 }
 0x1d5   : > { %v723_v42 = vcombine.high %v721_v12, %v721_v12  ;;  %v737_v13 = vrot.slane %v721_v12, %v5896_v45  ;;  %v744_v17 = vrot.slane %v722_v0, %v5896_v45  ;;  %v752_v58 = vcombine.high %v730_v39, %v730_v39 }
 0x1d6   : > { %v808_v43 = vrot.slane %v730_v39, %v5903_v62  ;;  %v756_v44 = vcombine.high %v690_v40, %v690_v40  ;;  %v763_v46 = vrot.slane %v690_v40, %v5896_v45 }
 0x1d7   : > { %v751_v47 = vrot.slane %v723_v42, %v5896_v45  ;;  %v753_v48 = vcombine.high %v737_v13, %v737_v13  ;;  %v754_v49 = vcombine.high %v744_v17, %v744_v17  ;;  %v812_v50 = vrot.slane %v744_v17, %v5903_v62 }
 0x1d8   : > { %v816_v25 = vrot.slane %v752_v58, %v5903_v62  ;;  %v824_v32 = vrot.slane %v737_v13, %v5903_v62  ;;  %v770_v51 = vrot.slane %v756_v44, %v5896_v45  ;;  %v771_v52 = vcombine.high %v763_v46, %v763_v46 }
 0x1d9   : > { %v755_v54 = vcombine.high %v751_v47, %v751_v47  ;;  %v820_v55 = vrot.slane %v754_v49, %v5903_v62  ;;  %v828_v56 = vrot.slane %v751_v47, %v5903_v62  ;;  %v832_v57 = vrot.slane %v753_v48, %v5903_v62 }
 0x1da   : > { %v869_v59 = vcombine.low %v808_v43, %v812_v50  ;;  %v772_v60 = vcombine.high %v770_v51, %v770_v51  ;;  %v779_v61 = vrot.slane %v763_v46, %v5896_v45  ;;  %v786_v63 = vrot.slane %v770_v51, %v5896_v45 }
 0x1db   : > { %v836_v1 = vrot.slane %v755_v54, %v5903_v62  ;;  %v870_v4 = vcombine.low %v816_v25, %v820_v55  ;;  %v886_v5 = vcombine.low %v824_v32, %v828_v56  ;;  %v793_v6 = vrot.slane %v771_v52, %v5896_v45 }
 0x1dc   : > { %v877_v7 = vrot.slane %v869_v59, %v5913_v19  ;;  %v800_v37 = vrot.slane %v772_v60, %v5896_v45  ;;  %v801_v8 = vcombine.high %v779_v61, %v779_v61  ;;  %v802_v9 = vcombine.high %v786_v63, %v786_v63 }
 0x1dd   : > { %v884_v10 = vrot.slane %v870_v4, %v5913_v19  ;;  %v887_v11 = vcombine.low %v832_v57, %v836_v1  ;;  %v894_v14 = vrot.slane %v886_v5, %v5913_v19  ;;  %v803_v16 = vcombine.high %v793_v6, %v793_v6 }
 0x1de   : > { %v804_v53 = vcombine.high %v800_v37, %v800_v37  ;;  %v840_v18 = vrot.slane %v779_v61, %v5903_v62  ;;  %v844_v20 = vrot.slane %v793_v6, %v5903_v62  ;;  %v848_v38 = vrot.slane %v801_v8, %v5903_v62 }
 0x1df   : > { %v885_v21 = vcombine.low %v877_v7, %v884_v10  ;;  %v901_v22 = vrot.slane %v887_v11, %v5913_v19  ;;  %v852_v23 = vrot.slane %v803_v16, %v5903_v62  ;;  %v856_v24 = vrot.slane %v786_v63, %v5903_v62 }
 0x1e0   : > { %v860_v2 = vrot.slane %v800_v37, %v5903_v62  ;;  %v864_v26 = vrot.slane %v802_v9, %v5903_v62  ;;  %v868_v27 = vrot.slane %v804_v53, %v5903_v62  ;;  %v903_v28 = vcombine.low %v840_v18, %v844_v20 }
 0x1e1   : > { %v902_v29 = vcombine.low %v894_v14, %v901_v22  ;;  %942 = vst.msk [vmem:[%s6155_s25] sm:$0xff] %vm941_vm0, %v885_v21  ;;  %v904_v30 = vcombine.low %v848_v38, %v852_v23 }
 0x1e2   : > { %v911_v3 = vrot.slane %v903_v28, %v5913_v19  ;;  %v920_v31 = vcombine.low %v856_v24, %v860_v2  ;;  %v921_v33 = vcombine.low %v864_v26, %v868_v27  ;;  %v1288_v41 = vpop.trf.xlu1 }
 0x1e3   : > { %943 = vst.msk [vmem:[%s6155_s25 + $0x8] sm:$0xff] %vm941_vm0, %v902_v29  ;;  %v918_v34 = vrot.slane %v904_v30, %v5913_v19  ;;  %v1306_v15 = vcombine.high %v1288_v41, %v1288_v41  ;;  %v1313_v35 = vrot.slane %v1288_v41, %v5896_v45 }
 0x1e4   : > { %v928_v36 = vrot.slane %v920_v31, %v5913_v19  ;;  %v935_v12 = vrot.slane %v921_v33, %v5913_v19 }
 0x1e5   : > { %v919_v0 = vcombine.low %v911_v3, %v918_v34  ;;  %v1320_v39 = vrot.slane %v1306_v15, %v5896_v45  ;;  %v1321_v40 = vcombine.high %v1313_v35, %v1313_v35  ;;  %v1329_v42 = vrot.slane %v1313_v35, %v5896_v45 }
 0x1e6   : > { %v936_v13 = vcombine.low %v928_v36, %v935_v12  ;;  %v1289_v17 = vpop.trf.xlu1 }
 0x1e7   : > { %944 = vst.msk [vmem:[%s6155_s25 + $0x10] sm:$0xff] %vm941_vm0, %v919_v0  ;;  %v1322_v58 = vcombine.high %v1320_v39, %v1320_v39  ;;  %v1336_v43 = vrot.slane %v1320_v39, %v5896_v45  ;;  %v1343_v44 = vrot.slane %v1321_v40, %v5896_v45  ;;  %v1351_v46 = vcombine.high %v1329_v42, %v1329_v42 }
 0x1e8   : > { %945 = vst.msk [vmem:[%s6155_s25 + $0x18] sm:$0xff] %vm941_vm0, %v936_v13  ;;  %v1407_v47 = vrot.slane %v1329_v42, %v5903_v62  ;;  %v1355_v48 = vcombine.high %v1289_v17, %v1289_v17  ;;  %v1362_v49 = vrot.slane %v1289_v17, %v5896_v45 }
 0x1e9   : > { %v1350_v50 = vrot.slane %v1322_v58, %v5896_v45  ;;  %v1352_v25 = vcombine.high %v1336_v43, %v1336_v43  ;;  %v1353_v32 = vcombine.high %v1343_v44, %v1343_v44  ;;  %v1411_v51 = vrot.slane %v1343_v44, %v5903_v62 }
 0x1ea   : > { %v1415_v52 = vrot.slane %v1351_v46, %v5903_v62  ;;  %v1423_v54 = vrot.slane %v1336_v43, %v5903_v62  ;;  %v1369_v55 = vrot.slane %v1355_v48, %v5896_v45  ;;  %v1370_v56 = vcombine.high %v1362_v49, %v1362_v49 }
 0x1eb   : > { %v1354_v57 = vcombine.high %v1350_v50, %v1350_v50  ;;  %v1419_v59 = vrot.slane %v1353_v32, %v5903_v62  ;;  %v1427_v60 = vrot.slane %v1350_v50, %v5903_v62  ;;  %v1431_v61 = vrot.slane %v1352_v25, %v5903_v62 }
 0x1ec   : > { %v1468_v63 = vcombine.low %v1407_v47, %v1411_v51  ;;  %v1371_v1 = vcombine.high %v1369_v55, %v1369_v55  ;;  %v1378_v4 = vrot.slane %v1362_v49, %v5896_v45  ;;  %v1385_v5 = vrot.slane %v1369_v55, %v5896_v45 }
 0x1ed   : > { %v1435_v6 = vrot.slane %v1354_v57, %v5903_v62  ;;  %v1469_v7 = vcombine.low %v1415_v52, %v1419_v59  ;;  %v1485_v37 = vcombine.low %v1423_v54, %v1427_v60  ;;  %v1392_v8 = vrot.slane %v1370_v56, %v5896_v45 }
 0x1ee   : > { %v1476_v9 = vrot.slane %v1468_v63, %v5913_v19  ;;  %v1399_v10 = vrot.slane %v1371_v1, %v5896_v45  ;;  %v1400_v11 = vcombine.high %v1378_v4, %v1378_v4  ;;  %v1401_v14 = vcombine.high %v1385_v5, %v1385_v5 }
 0x1ef   : > { %v1483_v16 = vrot.slane %v1469_v7, %v5913_v19  ;;  %v1486_v53 = vcombine.low %v1431_v61, %v1435_v6  ;;  %v1493_v18 = vrot.slane %v1485_v37, %v5913_v19  ;;  %v1402_v20 = vcombine.high %v1392_v8, %v1392_v8 }
 0x1f0   : > { %v1403_v38 = vcombine.high %v1399_v10, %v1399_v10  ;;  %v1439_v21 = vrot.slane %v1378_v4, %v5903_v62  ;;  %v1443_v22 = vrot.slane %v1392_v8, %v5903_v62  ;;  %v1447_v23 = vrot.slane %v1400_v11, %v5903_v62 }
 0x1f1   : > { %v1484_v24 = vcombine.low %v1476_v9, %v1483_v16  ;;  %v1500_v2 = vrot.slane %v1486_v53, %v5913_v19  ;;  %v1451_v26 = vrot.slane %v1402_v20, %v5903_v62  ;;  %v1455_v27 = vrot.slane %v1385_v5, %v5903_v62 }
 0x1f2   : > { %v1459_v28 = vrot.slane %v1399_v10, %v5903_v62  ;;  %v1463_v29 = vrot.slane %v1401_v14, %v5903_v62  ;;  %v1467_v30 = vrot.slane %v1403_v38, %v5903_v62  ;;  %v1502_v3 = vcombine.low %v1439_v21, %v1443_v22  ;;  %v1887_v31 = vpop.trf.xlu1 }
 0x1f3   : > { %v1501_v33 = vcombine.low %v1493_v18, %v1500_v2  ;;  %5275 = vst.msk [vmem:[%s6155_s25 + $0x20] sm:$0xff] %vm941_vm0, %v1484_v24  ;;  %v1503_v41 = vcombine.low %v1447_v23, %v1451_v26  ;;  %v1905_v34 = vcombine.high %v1887_v31, %v1887_v31  ;;  %v1912_v15 = vrot.slane %v1887_v31, %v5896_v45 }
 0x1f4   : > { %v1510_v35 = vrot.slane %v1502_v3, %v5913_v19  ;;  %v1519_v36 = vcombine.low %v1455_v27, %v1459_v28  ;;  %v1520_v12 = vcombine.low %v1463_v29, %v1467_v30 }
 0x1f5   : > { %5276 = vst.msk [vmem:[%s6155_s25 + $0x28] sm:$0xff] %vm941_vm0, %v1501_v33  ;;  %v1517_v0 = vrot.slane %v1503_v41, %v5913_v19  ;;  %v1919_v39 = vrot.slane %v1905_v34, %v5896_v45  ;;  %v1920_v40 = vcombine.high %v1912_v15, %v1912_v15  ;;  %v1928_v42 = vrot.slane %v1912_v15, %v5896_v45 }
 0x1f6   : > { %v1527_v13 = vrot.slane %v1519_v36, %v5913_v19  ;;  %v1534_v17 = vrot.slane %v1520_v12, %v5913_v19  ;;  %v1888_v58 = vpop.trf.xlu1 }
 0x1f7   : > { %v1518_v43 = vcombine.low %v1510_v35, %v1517_v0  ;;  %v1921_v44 = vcombine.high %v1919_v39, %v1919_v39  ;;  %v1935_v46 = vrot.slane %v1919_v39, %v5896_v45  ;;  %v1942_v47 = vrot.slane %v1920_v40, %v5896_v45 }
 0x1f8   : > { %v1535_v48 = vcombine.low %v1527_v13, %v1534_v17  ;;  %v1950_v49 = vcombine.high %v1928_v42, %v1928_v42  ;;  %v2006_v50 = vrot.slane %v1928_v42, %v5903_v62  ;;  %v1954_v25 = vcombine.high %v1888_v58, %v1888_v58 }
 0x1f9   : > { %5277 = vst.msk [vmem:[%s6155_s25 + $0x30] sm:$0xff] %vm941_vm0, %v1518_v43  ;;  %v1949_v32 = vrot.slane %v1921_v44, %v5896_v45  ;;  %v1951_v51 = vcombine.high %v1935_v46, %v1935_v46  ;;  %v1952_v52 = vcombine.high %v1942_v47, %v1942_v47  ;;  %v2010_v54 = vrot.slane %v1942_v47, %v5903_v62 }
 0x1fa   : > { %5278 = vst.msk [vmem:[%s6155_s25 + $0x38] sm:$0xff] %vm941_vm0, %v1535_v48  ;;  %v2014_v55 = vrot.slane %v1950_v49, %v5903_v62  ;;  %v2022_v56 = vrot.slane %v1935_v46, %v5903_v62  ;;  %v1961_v57 = vrot.slane %v1888_v58, %v5896_v45  ;;  %v1968_v59 = vrot.slane %v1954_v25, %v5896_v45 }
 0x1fb   : > { %v1953_v60 = vcombine.high %v1949_v32, %v1949_v32  ;;  %v2018_v61 = vrot.slane %v1952_v52, %v5903_v62  ;;  %v2026_v63 = vrot.slane %v1949_v32, %v5903_v62  ;;  %v2030_v1 = vrot.slane %v1951_v51, %v5903_v62 }
 0x1fc   : > { %v2067_v4 = vcombine.low %v2006_v50, %v2010_v54  ;;  %v1969_v5 = vcombine.high %v1961_v57, %v1961_v57  ;;  %v1970_v6 = vcombine.high %v1968_v59, %v1968_v59  ;;  %v1977_v7 = vrot.slane %v1961_v57, %v5896_v45 }
 0x1fd   : > { %v2034_v37 = vrot.slane %v1953_v60, %v5903_v62  ;;  %v2068_v8 = vcombine.low %v2014_v55, %v2018_v61  ;;  %v2084_v9 = vcombine.low %v2022_v56, %v2026_v63  ;;  %v1984_v10 = vrot.slane %v1968_v59, %v5896_v45 }
 0x1fe   : > { %v2075_v11 = vrot.slane %v2067_v4, %v5913_v19  ;;  %v1991_v14 = vrot.slane %v1969_v5, %v5896_v45  ;;  %v1998_v16 = vrot.slane %v1970_v6, %v5896_v45  ;;  %v1999_v53 = vcombine.high %v1977_v7, %v1977_v7 }
 0x1ff   : > { %v2082_v18 = vrot.slane %v2068_v8, %v5913_v19  ;;  %v2085_v20 = vcombine.low %v2030_v1, %v2034_v37  ;;  %v2092_v38 = vrot.slane %v2084_v9, %v5913_v19  ;;  %v2000_v21 = vcombine.high %v1984_v10, %v1984_v10 }
 0x200   : > { %v2001_v22 = vcombine.high %v1991_v14, %v1991_v14  ;;  %v2002_v23 = vcombine.high %v1998_v16, %v1998_v16  ;;  %v2038_v24 = vrot.slane %v1977_v7, %v5903_v62  ;;  %v2042_v2 = vrot.slane %v1991_v14, %v5903_v62 }
 0x201   : > { %v2083_v26 = vcombine.low %v2075_v11, %v2082_v18  ;;  %v2099_v27 = vrot.slane %v2085_v20, %v5913_v19  ;;  %v2046_v28 = vrot.slane %v1999_v53, %v5903_v62  ;;  %v2054_v29 = vrot.slane %v1984_v10, %v5903_v62 }
 0x202   : > { %v2050_v30 = vrot.slane %v2001_v22, %v5903_v62  ;;  %v2058_v3 = vrot.slane %v1998_v16, %v5903_v62  ;;  %v2062_v31 = vrot.slane %v2000_v21, %v5903_v62  ;;  %v2066_v33 = vrot.slane %v2002_v23, %v5903_v62  ;;  %v2486_v41 = vpop.trf.xlu1 }
 0x203   : > { %v2100_v34 = vcombine.low %v2092_v38, %v2099_v27  ;;  %5287 = vst.msk [vmem:[%s6155_s25 + $0x40] sm:$0xff] %vm941_vm0, %v2083_v26  ;;  %v2101_v15 = vcombine.low %v2038_v24, %v2042_v2  ;;  %v2504_v35 = vcombine.high %v2486_v41, %v2486_v41  ;;  %v2511_v36 = vrot.slane %v2486_v41, %v5896_v45 }
 0x204   : > { %v2102_v12 = vcombine.low %v2046_v28, %v2050_v30  ;;  %v2118_v0 = vcombine.low %v2054_v29, %v2058_v3  ;;  %v2119_v39 = vcombine.low %v2062_v31, %v2066_v33 }
 0x205   : > { %5288 = vst.msk [vmem:[%s6155_s25 + $0x48] sm:$0xff] %vm941_vm0, %v2100_v34  ;;  %v2109_v40 = vrot.slane %v2101_v15, %v5913_v19  ;;  %v2518_v42 = vrot.slane %v2504_v35, %v5896_v45  ;;  %v2519_v13 = vcombine.high %v2511_v36, %v2511_v36  ;;  %v2527_v17 = vrot.slane %v2511_v36, %v5896_v45 }
 0x206   : > { %v2116_v58 = vrot.slane %v2102_v12, %v5913_v19  ;;  %v2126_v43 = vrot.slane %v2118_v0, %v5913_v19  ;;  %v2133_v44 = vrot.slane %v2119_v39, %v5913_v19  ;;  %v2487_v46 = vpop.trf.xlu1 }
 0x207   : > { %v2520_v47 = vcombine.high %v2518_v42, %v2518_v42  ;;  %v2534_v48 = vrot.slane %v2518_v42, %v5896_v45  ;;  %v2541_v49 = vrot.slane %v2519_v13, %v5896_v45  ;;  %v2549_v50 = vcombine.high %v2527_v17, %v2527_v17 }
 0x208   : > { %v2117_v25 = vcombine.low %v2109_v40, %v2116_v58  ;;  %v2134_v32 = vcombine.low %v2126_v43, %v2133_v44  ;;  %v2605_v51 = vrot.slane %v2527_v17, %v5903_v62  ;;  %v2553_v52 = vcombine.high %v2487_v46, %v2487_v46 }
 0x209   : > { %v2548_v54 = vrot.slane %v2520_v47, %v5896_v45  ;;  %v2550_v55 = vcombine.high %v2534_v48, %v2534_v48  ;;  %v2551_v56 = vcombine.high %v2541_v49, %v2541_v49  ;;  %v2609_v57 = vrot.slane %v2541_v49, %v5903_v62 }
 0x20a   : > { %5289 = vst.msk [vmem:[%s6155_s25 + $0x50] sm:$0xff] %vm941_vm0, %v2117_v25  ;;  %5290 = vst.msk [vmem:[%s6155_s25 + $0x58] sm:$0xff] %vm941_vm0, %v2134_v32  ;;  %v2613_v59 = vrot.slane %v2549_v50, %v5903_v62  ;;  %v2621_v60 = vrot.slane %v2534_v48, %v5903_v62  ;;  %v2560_v61 = vrot.slane %v2487_v46, %v5896_v45 }
 0x20b   : > { %v2567_v63 = vrot.slane %v2553_v52, %v5896_v45  ;;  %v2552_v1 = vcombine.high %v2548_v54, %v2548_v54  ;;  %v2617_v4 = vrot.slane %v2551_v56, %v5903_v62  ;;  %v2625_v5 = vrot.slane %v2548_v54, %v5903_v62 }
 0x20c   : > { %v2629_v6 = vrot.slane %v2550_v55, %v5903_v62  ;;  %v2666_v7 = vcombine.low %v2605_v51, %v2609_v57  ;;  %v2568_v37 = vcombine.high %v2560_v61, %v2560_v61  ;;  %v2576_v9 = vrot.slane %v2560_v61, %v5896_v45 }
 0x20d   : > { %v2569_v8 = vcombine.high %v2567_v63, %v2567_v63  ;;  %v2633_v10 = vrot.slane %v2552_v1, %v5903_v62  ;;  %v2667_v11 = vcombine.low %v2613_v59, %v2617_v4  ;;  %v2683_v14 = vcombine.low %v2621_v60, %v2625_v5 }
 0x20e   : > { %v2583_v16 = vrot.slane %v2567_v63, %v5896_v45  ;;  %v2674_v53 = vrot.slane %v2666_v7, %v5913_v19  ;;  %v2590_v18 = vrot.slane %v2568_v37, %v5896_v45  ;;  %v2598_v38 = vcombine.high %v2576_v9, %v2576_v9 }
 0x20f   : > { %v2597_v20 = vrot.slane %v2569_v8, %v5896_v45  ;;  %v2681_v21 = vrot.slane %v2667_v11, %v5913_v19  ;;  %v2684_v22 = vcombine.low %v2629_v6, %v2633_v10  ;;  %v2691_v23 = vrot.slane %v2683_v14, %v5913_v19 }
 0x210   : > { %v2599_v24 = vcombine.high %v2583_v16, %v2583_v16  ;;  %v2600_v2 = vcombine.high %v2590_v18, %v2590_v18  ;;  %v2637_v27 = vrot.slane %v2576_v9, %v5903_v62  ;;  %v2641_v28 = vrot.slane %v2590_v18, %v5903_v62 }
 0x211   : > { %v2601_v26 = vcombine.high %v2597_v20, %v2597_v20  ;;  %v2682_v29 = vcombine.low %v2674_v53, %v2681_v21  ;;  %v2698_v30 = vrot.slane %v2684_v22, %v5913_v19  ;;  %v2645_v3 = vrot.slane %v2598_v38, %v5903_v62 }
 0x212   : > { %v2653_v31 = vrot.slane %v2583_v16, %v5903_v62  ;;  %v2649_v33 = vrot.slane %v2600_v2, %v5903_v62  ;;  %v2657_v41 = vrot.slane %v2597_v20, %v5903_v62  ;;  %v2661_v34 = vrot.slane %v2599_v24, %v5903_v62  ;;  %v3085_v35 = vpop.trf.xlu1 }
 0x213   : > { %v2665_v15 = vrot.slane %v2601_v26, %v5903_v62  ;;  %v2699_v36 = vcombine.low %v2691_v23, %v2698_v30  ;;  %5299 = vst.msk [vmem:[%s6155_s25 + $0x60] sm:$0xff] %vm941_vm0, %v2682_v29  ;;  %v2700_v12 = vcombine.low %v2637_v27, %v2641_v28  ;;  %v3103_v0 = vcombine.high %v3085_v35, %v3085_v35 }
 0x214   : > { %v3110_v39 = vrot.slane %v3085_v35, %v5896_v45  ;;  %v2701_v40 = vcombine.low %v2645_v3, %v2649_v33  ;;  %v2717_v42 = vcombine.low %v2653_v31, %v2657_v41 }
 0x215   : > { %v2718_v13 = vcombine.low %v2661_v34, %v2665_v15  ;;  %5300 = vst.msk [vmem:[%s6155_s25 + $0x68] sm:$0xff] %vm941_vm0, %v2699_v36  ;;  %v2708_v17 = vrot.slane %v2700_v12, %v5913_v19  ;;  %v3117_v58 = vrot.slane %v3103_v0, %v5896_v45 }
 0x216   : > { %v3118_v43 = vcombine.high %v3110_v39, %v3110_v39  ;;  %v3126_v44 = vrot.slane %v3110_v39, %v5896_v45  ;;  %v2715_v46 = vrot.slane %v2701_v40, %v5913_v19  ;;  %v2725_v47 = vrot.slane %v2717_v42, %v5913_v19  ;;  %v3086_v49 = vpop.trf.xlu1 }
 0x217   : > { %v2732_v48 = vrot.slane %v2718_v13, %v5913_v19  ;;  %v3119_v50 = vcombine.high %v3117_v58, %v3117_v58  ;;  %v3133_v25 = vrot.slane %v3117_v58, %v5896_v45  ;;  %v3152_v56 = vcombine.high %v3086_v49, %v3086_v49 }
 0x218   : > { %v3140_v32 = vrot.slane %v3118_v43, %v5896_v45  ;;  %v3148_v51 = vcombine.high %v3126_v44, %v3126_v44  ;;  %v2716_v52 = vcombine.low %v2708_v17, %v2715_v46  ;;  %v3204_v55 = vrot.slane %v3126_v44, %v5903_v62 }
 0x219   : > { %v2733_v54 = vcombine.low %v2725_v47, %v2732_v48  ;;  %v3147_v57 = vrot.slane %v3119_v50, %v5896_v45  ;;  %v3149_v59 = vcombine.high %v3133_v25, %v3133_v25  ;;  %v3220_v1 = vrot.slane %v3133_v25, %v5903_v62 }
 0x21a   : > { %v3150_v60 = vcombine.high %v3140_v32, %v3140_v32  ;;  %v3208_v61 = vrot.slane %v3140_v32, %v5903_v62  ;;  %5301 = vst.msk [vmem:[%s6155_s25 + $0x70] sm:$0xff] %vm941_vm0, %v2716_v52  ;;  %v3212_v63 = vrot.slane %v3148_v51, %v5903_v62  ;;  %v3159_v4 = vrot.slane %v3086_v49, %v5896_v45 }
 0x21b   : > { %5302 = vst.msk [vmem:[%s6155_s25 + $0x78] sm:$0xff] %vm941_vm0, %v2733_v54  ;;  %v3166_v5 = vrot.slane %v3152_v56, %v5896_v45  ;;  %v3151_v6 = vcombine.high %v3147_v57, %v3147_v57  ;;  %v3224_v37 = vrot.slane %v3147_v57, %v5903_v62  ;;  %v3228_v8 = vrot.slane %v3149_v59, %v5903_v62 }
 0x21c   : > { %v3216_v7 = vrot.slane %v3150_v60, %v5903_v62  ;;  %v3265_v9 = vcombine.low %v3204_v55, %v3208_v61  ;;  %v3167_v10 = vcombine.high %v3159_v4, %v3159_v4  ;;  %v3175_v14 = vrot.slane %v3159_v4, %v5896_v45 }
 0x21d   : > { %v3168_v11 = vcombine.high %v3166_v5, %v3166_v5  ;;  %v3232_v16 = vrot.slane %v3151_v6, %v5903_v62  ;;  %v3282_v18 = vcombine.low %v3220_v1, %v3224_v37  ;;  %v3182_v20 = vrot.slane %v3166_v5, %v5896_v45 }
 0x21e   : > { %v3266_v53 = vcombine.low %v3212_v63, %v3216_v7  ;;  %v3273_v38 = vrot.slane %v3265_v9, %v5913_v19  ;;  %v3189_v21 = vrot.slane %v3167_v10, %v5896_v45  ;;  %v3197_v23 = vcombine.high %v3175_v14, %v3175_v14 }
 0x21f   : > { %v3196_v22 = vrot.slane %v3168_v11, %v5896_v45  ;;  %v3283_v2 = vcombine.low %v3228_v8, %v3232_v16  ;;  %v3290_v26 = vrot.slane %v3282_v18, %v5913_v19  ;;  %v3198_v27 = vcombine.high %v3182_v20, %v3182_v20 }
 0x220   : > { %v3280_v24 = vrot.slane %v3266_v53, %v5913_v19  ;;  %v3199_v28 = vcombine.high %v3189_v21, %v3189_v21  ;;  %v3236_v30 = vrot.slane %v3175_v14, %v5903_v62  ;;  %v3240_v3 = vrot.slane %v3189_v21, %v5903_v62 }
 0x221   : > { %v3200_v29 = vcombine.high %v3196_v22, %v3196_v22  ;;  %v3297_v33 = vrot.slane %v3283_v2, %v5913_v19  ;;  %v3244_v41 = vrot.slane %v3197_v23, %v5903_v62  ;;  %v3252_v34 = vrot.slane %v3182_v20, %v5903_v62 }
 0x222   : > { %v3281_v31 = vcombine.low %v3273_v38, %v3280_v24  ;;  %v3248_v15 = vrot.slane %v3199_v28, %v5903_v62  ;;  %v3256_v35 = vrot.slane %v3196_v22, %v5903_v62  ;;  %v3260_v36 = vrot.slane %v3198_v27, %v5903_v62  ;;  %v4015_v0 = vpop.trf.xlu1 }
 0x223   : > { %v3264_v12 = vrot.slane %v3200_v29, %v5903_v62  ;;  %v3298_v39 = vcombine.low %v3290_v26, %v3297_v33  ;;  %v3299_v40 = vcombine.low %v3236_v30, %v3240_v3  ;;  %v4033_v42 = vcombine.high %v4015_v0, %v4015_v0 }
 0x224   : > { %5311 = vst.msk [vmem:[%s6155_s25 + $0x80] sm:$0xff] %vm941_vm0, %v3281_v31  ;;  %v4040_v13 = vrot.slane %v4015_v0, %v5896_v45  ;;  %v3300_v17 = vcombine.low %v3244_v41, %v3248_v15  ;;  %v3316_v58 = vcombine.low %v3252_v34, %v3256_v35 }
 0x225   : > { %v3317_v43 = vcombine.low %v3260_v36, %v3264_v12  ;;  %5312 = vst.msk [vmem:[%s6155_s25 + $0x88] sm:$0xff] %vm941_vm0, %v3298_v39  ;;  %v3307_v44 = vrot.slane %v3299_v40, %v5913_v19  ;;  %v4047_v46 = vrot.slane %v4033_v42, %v5896_v45 }
 0x226   : > { %v4048_v47 = vcombine.high %v4040_v13, %v4040_v13  ;;  %v4056_v48 = vrot.slane %v4040_v13, %v5896_v45  ;;  %v3314_v49 = vrot.slane %v3300_v17, %v5913_v19  ;;  %v3324_v50 = vrot.slane %v3316_v58, %v5913_v19  ;;  %v4016_v32 = vpop.trf.xlu1 }
 0x227   : > { %v3331_v25 = vrot.slane %v3317_v43, %v5913_v19  ;;  %v4049_v51 = vcombine.high %v4047_v46, %v4047_v46  ;;  %v4063_v52 = vrot.slane %v4047_v46, %v5896_v45  ;;  %v4082_v59 = vcombine.high %v4016_v32, %v4016_v32 }
 0x228   : > { %v4070_v54 = vrot.slane %v4048_v47, %v5896_v45  ;;  %v4078_v55 = vcombine.high %v4056_v48, %v4056_v48  ;;  %v3315_v56 = vcombine.low %v3307_v44, %v3314_v49  ;;  %v4134_v4 = vrot.slane %v4056_v48, %v5903_v62 }
 0x229   : > { %v3332_v57 = vcombine.low %v3324_v50, %v3331_v25  ;;  %v4077_v60 = vrot.slane %v4049_v51, %v5896_v45  ;;  %v4079_v61 = vcombine.high %v4063_v52, %v4063_v52  ;;  %v4089_v6 = vrot.slane %v4016_v32, %v5896_v45 }
 0x22a   : > { %v4080_v63 = vcombine.high %v4070_v54, %v4070_v54  ;;  %v4138_v1 = vrot.slane %v4070_v54, %v5903_v62  ;;  %5313 = vst.msk [vmem:[%s6155_s25 + $0x90] sm:$0xff] %vm941_vm0, %v3315_v56  ;;  %v6354_v5 = vrot.slane %v4078_v55, %v5903_v62  ;;  %v4096_v7 = vrot.slane %v4082_v59, %v5896_v45  ;;  %v4614_v37 = vpop.trf.xlu1 }
 0x22b   : > { %5314 = vst.msk [vmem:[%s6155_s25 + $0x98] sm:$0xff] %vm941_vm0, %v3332_v57  ;;  %v4081_v8 = vcombine.high %v4077_v60, %v4077_v60  ;;  %v4150_v10 = vrot.slane %v4063_v52, %v5903_v62  ;;  %v4154_v11 = vrot.slane %v4077_v60, %v5903_v62  ;;  %v6364_v14 = vrot.slane %v4079_v61, %v5903_v62 }
 0x22c   : > { %v6359_v9 = vrot.slane %v4080_v63, %v5903_v62  ;;  %v4097_v16 = vcombine.high %v4089_v6, %v4089_v6  ;;  %v4098_v53 = vcombine.high %v4096_v7, %v4096_v7  ;;  %v4105_v18 = vrot.slane %v4089_v6, %v5896_v45 }
 0x22d   : > { %v4162_v20 = vrot.slane %v4081_v8, %v5903_v62  ;;  %v6368_v38 = vcombine.low %v4134_v4, %v4138_v1  ;;  %v4112_v21 = vrot.slane %v4096_v7, %v5896_v45  ;;  %v4632_v22 = vcombine.high %v4614_v37, %v4614_v37 }
 0x22e   : > { %v6371_v23 = vcombine.low %v4150_v10, %v4154_v11  ;;  %v4119_v24 = vrot.slane %v4097_v16, %v5896_v45  ;;  %v4126_v2 = vrot.slane %v4098_v53, %v5896_v45  ;;  %v4127_v26 = vcombine.high %v4105_v18, %v4105_v18  ;;  %v4615_v12 = vpop.trf.xlu1 }
 0x22f   : > { %v4128_v27 = vcombine.high %v4112_v21, %v4112_v21  ;;  %v4166_v28 = vrot.slane %v4105_v18, %v5903_v62  ;;  %v4639_v29 = vrot.slane %v4614_v37, %v5896_v45  ;;  %v4646_v30 = vrot.slane %v4632_v22, %v5896_v45 }
 0x230   : > { %v4129_v3 = vcombine.high %v4119_v24, %v4119_v24  ;;  %v4130_v31 = vcombine.high %v4126_v2, %v4126_v2  ;;  %v4170_v33 = vrot.slane %v4119_v24, %v5903_v62  ;;  %v4182_v41 = vrot.slane %v4112_v21, %v5903_v62 }
 0x231   : > { %v4174_v34 = vrot.slane %v4127_v26, %v5903_v62  ;;  %v4186_v15 = vrot.slane %v4126_v2, %v5903_v62  ;;  %v4647_v35 = vcombine.high %v4639_v29, %v4639_v29  ;;  %v4648_v36 = vcombine.high %v4646_v30, %v4646_v30 }
 0x232   : > { %v4178_v0 = vrot.slane %v4129_v3, %v5903_v62  ;;  %v6384_v39 = vrot.slane %v4128_v27, %v5903_v62  ;;  %v6387_v40 = vrot.slane %v4130_v31, %v5903_v62  ;;  %v4655_v42 = vrot.slane %v4639_v29, %v5896_v45 }
 0x233   : > { %v4229_v13 = vcombine.low %v4166_v28, %v4170_v33  ;;  %v4662_v17 = vrot.slane %v4646_v30, %v5896_v45  ;;  %v4669_v58 = vrot.slane %v4647_v35, %v5896_v45  ;;  %v4676_v43 = vrot.slane %v4648_v36, %v5896_v45 }
 0x234   : > { %v4230_v44 = vcombine.low %v4174_v34, %v4178_v0  ;;  %v6393_v46 = vcombine.low %v4182_v41, %v4186_v15  ;;  %v4677_v47 = vcombine.high %v4655_v42, %v4655_v42  ;;  %v4681_v48 = vcombine.high %v4615_v12, %v4615_v12 }
 0x235   : > { %v4678_v49 = vcombine.high %v4662_v17, %v4662_v17  ;;  %v4679_v50 = vcombine.high %v4669_v58, %v4669_v58  ;;  %v4680_v25 = vcombine.high %v4676_v43, %v4676_v43  ;;  %v4737_v32 = vrot.slane %v4669_v58, %v5903_v62 }
 0x236   : > { %v4733_v51 = vrot.slane %v4655_v42, %v5903_v62  ;;  %v4741_v52 = vrot.slane %v4677_v47, %v5903_v62  ;;  %v4753_v54 = vrot.slane %v4676_v43, %v5903_v62  ;;  %v4688_v55 = vrot.slane %v4615_v12, %v5896_v45 }
 0x237   : > { %v4745_v56 = vrot.slane %v4679_v50, %v5903_v62  ;;  %v4749_v57 = vrot.slane %v4662_v17, %v5903_v62  ;;  %v4757_v59 = vrot.slane %v4678_v49, %v5903_v62  ;;  %v4761_v60 = vrot.slane %v4680_v25, %v5903_v62 }
 0x238   : > { %v4794_v61 = vcombine.low %v4733_v51, %v4737_v32  ;;  %v4695_v63 = vrot.slane %v4681_v48, %v5896_v45  ;;  %v4696_v1 = vcombine.high %v4688_v55, %v4688_v55  ;;  %v4704_v4 = vrot.slane %v4688_v55, %v5896_v45 }
 0x239   : > { %v4811_v6 = vcombine.low %v4749_v57, %v4753_v54  ;;  %v4196_v7 = vcombine.low %v6354_v5, %v6359_v9  ;;  %v4203_v37 = vrot.slane %v6368_v38, %v5913_v19  ;;  %v4213_v8 = vcombine.low %v6364_v14, %v4162_v20  ;;  %v3684_v20 = vpop.trf.xlu0 }
 0x23a   : > { %v4697_v10 = vcombine.high %v4695_v63, %v4695_v63  ;;  %v4711_v11 = vrot.slane %v4695_v63, %v5896_v45  ;;  %v4718_v16 = vrot.slane %v4696_v1, %v5896_v45  ;;  %v4726_v53 = vcombine.high %v4704_v4, %v4704_v4 }
 0x23b   : > { %v4765_v18 = vrot.slane %v4704_v4, %v5903_v62  ;;  %v4210_v21 = vrot.slane %v4196_v7, %v5913_v19  ;;  %v4220_v22 = vrot.slane %v6371_v23, %v5913_v19  ;;  %v4227_v5 = vrot.slane %v4213_v8, %v5913_v19 }
 0x23c   : > { %v4725_v9 = vrot.slane %v4697_v10, %v5896_v45  ;;  %v4727_v38 = vcombine.high %v4711_v11, %v4711_v11  ;;  %v4728_v24 = vcombine.high %v4718_v16, %v4718_v16  ;;  %v4769_v14 = vrot.slane %v4718_v16, %v5903_v62 }
 0x23d   : > { %v4773_v2 = vrot.slane %v4726_v53, %v5903_v62  ;;  %v4781_v26 = vrot.slane %v4711_v11, %v5903_v62  ;;  %v4211_v27 = vcombine.low %v4203_v37, %v4210_v21  ;;  %v4237_v28 = vrot.slane %v4229_v13, %v5913_v19  ;;  %v3685_v48 = vpop.trf.xlu0 }
 0x23e   : > { %v4729_v29 = vcombine.high %v4725_v9, %v4725_v9  ;;  %v4777_v30 = vrot.slane %v4728_v24, %v5903_v62  ;;  %v4785_v23 = vrot.slane %v4725_v9, %v5903_v62  ;;  %v4228_v3 = vcombine.low %v4220_v22, %v4227_v5 }
 0x23f   : > { %v4789_v31 = vrot.slane %v4727_v38, %v5903_v62  ;;  %v4828_v33 = vcombine.low %v4765_v18, %v4769_v14  ;;  %4267 = vxpose.xlu1.b32.start [1/4] (short) (narrow) %v4211_v27, 16  ;;  %v4244_v41 = vrot.slane %v4230_v44, %v5913_v19  ;;  %v4795_v34 = vcombine.low %v4741_v52, %v4745_v56 }
 0x240   : > { %v4793_v15 = vrot.slane %v4729_v29, %v5903_v62  ;;  %v4829_v35 = vcombine.low %v4773_v2, %v4777_v30  ;;  %v4845_v36 = vcombine.low %v4781_v26, %v4785_v23  ;;  %v4247_v12 = vcombine.low %v6384_v39, %v6387_v40 }
 0x241   : > { %v4245_v0 = vcombine.low %v4237_v28, %v4244_v41  ;;  %v4802_v42 = vrot.slane %v4794_v61, %v5913_v19  ;;  %v4809_v13 = vrot.slane %v4795_v34, %v5913_v19  ;;  %v4812_v17 = vcombine.low %v4757_v59, %v4761_v60 }
 0x242   : > { %v4254_v58 = vrot.slane %v6393_v46, %v5913_v19  ;;  %v4261_v43 = vrot.slane %v4247_v12, %v5913_v19  ;;  %v4836_v44 = vrot.slane %v4828_v33, %v5913_v19  ;;  %v4843_v47 = vrot.slane %v4829_v35, %v5913_v19 }
 0x243   : > { %4268 = vxpose.xlu1.b32.cont [2/4] (short) (narrow) %v4228_v3, 16  ;;  %v4810_v49 = vcombine.low %v4802_v42, %v4809_v13  ;;  %v4826_v39 = vrot.slane %v4812_v17, %v5913_v19  ;;  %v4846_v40 = vcombine.low %v4789_v31, %v4793_v15  ;;  %v4853_v50 = vrot.slane %v4845_v36, %v5913_v19 }
 0x244   : > { %v4262_v25 = vcombine.low %v4254_v58, %v4261_v43  ;;  %v4819_v32 = vrot.slane %v4811_v6, %v5913_v19  ;;  %v3702_v51 = vcombine.high %v3684_v20, %v3684_v20  ;;  %v3709_v46 = vrot.slane %v3684_v20, %v5896_v45 }
 0x245   : > { %4866 = vxpose.xlu0.b32.start [1/4] (short) (narrow) %v4810_v49, 16  ;;  %v4844_v52 = vcombine.low %v4836_v44, %v4843_v47  ;;  %v4860_v54 = vrot.slane %v4846_v40, %v5913_v19  ;;  %v3751_v55 = vcombine.high %v3685_v48, %v3685_v48  ;;  %v3758_v56 = vrot.slane %v3685_v48, %v5896_v45 }
 0x246   : > { %v4827_v57 = vcombine.low %v4819_v32, %v4826_v39  ;;  %v3716_v59 = vrot.slane %v3702_v51, %v5896_v45  ;;  %v3717_v60 = vcombine.high %v3709_v46, %v3709_v46  ;;  %v3725_v61 = vrot.slane %v3709_v46, %v5896_v45 }
 0x247   : > { %4269 = vxpose.xlu1.b32.cont [3/4] (short) (narrow) %v4245_v0, 16  ;;  %v4861_v63 = vcombine.low %v4853_v50, %v4860_v54  ;;  %v3765_v1 = vrot.slane %v3751_v55, %v5896_v45  ;;  %v3766_v4 = vcombine.high %v3758_v56, %v3758_v56  ;;  %v3774_v6 = vrot.slane %v3758_v56, %v5896_v45 }
 0x248   : > { %v3718_v7 = vcombine.high %v3716_v59, %v3716_v59  ;;  %v3732_v37 = vrot.slane %v3716_v59, %v5896_v45  ;;  %v3739_v8 = vrot.slane %v3717_v60, %v5896_v45  ;;  %v3747_v10 = vcombine.high %v3725_v61, %v3725_v61 }
 0x249   : > { %4867 = vxpose.xlu0.b32.cont [2/4] (short) (narrow) %v4827_v57, 16  ;;  %v3803_v11 = vrot.slane %v3725_v61, %v5903_v62  ;;  %v3767_v16 = vcombine.high %v3765_v1, %v3765_v1  ;;  %v3781_v53 = vrot.slane %v3765_v1, %v5896_v45  ;;  %v3788_v18 = vrot.slane %v3766_v4, %v5896_v45 }
 0x24a   : > { %v3746_v21 = vrot.slane %v3718_v7, %v5896_v45  ;;  %v3748_v22 = vcombine.high %v3732_v37, %v3732_v37  ;;  %v3749_v5 = vcombine.high %v3739_v8, %v3739_v8  ;;  %v3807_v9 = vrot.slane %v3739_v8, %v5903_v62 }
 0x24b   : > { %4270 = vxpose.xlu1.b32.end [4/4] (short) (narrow) %v4262_v25, 16  ;;  %v3811_v38 = vrot.slane %v3747_v10, %v5903_v62  ;;  %v3819_v24 = vrot.slane %v3732_v37, %v5903_v62  ;;  %v3795_v14 = vrot.slane %v3767_v16, %v5896_v45  ;;  %v3796_v20 = vcombine.high %v3774_v6, %v3774_v6 }
 0x24c   : > { %v3750_v2 = vcombine.high %v3746_v21, %v3746_v21  ;;  %v3815_v26 = vrot.slane %v3749_v5, %v5903_v62  ;;  %v3823_v27 = vrot.slane %v3746_v21, %v5903_v62  ;;  %v3827_v28 = vrot.slane %v3748_v22, %v5903_v62 }
 0x24d   : > { %4868 = vxpose.xlu0.b32.cont [3/4] (short) (narrow) %v4844_v52, 16  ;;  %v3864_v29 = vcombine.low %v3803_v11, %v3807_v9  ;;  %v3797_v30 = vcombine.high %v3781_v53, %v3781_v53  ;;  %v3798_v23 = vcombine.high %v3788_v18, %v3788_v18  ;;  %v3799_v3 = vcombine.high %v3795_v14, %v3795_v14 }
 0x24e   : > { %v3831_v31 = vrot.slane %v3750_v2, %v5903_v62  ;;  %v3865_v33 = vcombine.low %v3811_v38, %v3815_v26  ;;  %v3881_v41 = vcombine.low %v3819_v24, %v3823_v27  ;;  %v3835_v34 = vrot.slane %v3774_v6, %v5903_v62 }
 0x24f   : > { %v3872_v15 = vrot.slane %v3864_v29, %v5913_v19  ;;  %v3839_v35 = vrot.slane %v3788_v18, %v5903_v62  ;;  %v3843_v36 = vrot.slane %v3796_v20, %v5903_v62  ;;  %v3847_v12 = vrot.slane %v3798_v23, %v5903_v62 }
 0x250   : > { %v3879_v0 = vrot.slane %v3865_v33, %v5913_v19  ;;  %v3882_v42 = vcombine.low %v3827_v28, %v3831_v31  ;;  %v3889_v13 = vrot.slane %v3881_v41, %v5913_v19  ;;  %v3851_v17 = vrot.slane %v3781_v53, %v5903_v62 }
 0x251   : > { %4869 = vxpose.xlu0.b32.end [4/4] (short) (narrow) %v4861_v63, 16  ;;  %v3855_v58 = vrot.slane %v3795_v14, %v5903_v62  ;;  %v3859_v43 = vrot.slane %v3797_v30, %v5903_v62  ;;  %v3863_v44 = vrot.slane %v3799_v3, %v5903_v62  ;;  %v3898_v47 = vcombine.low %v3835_v34, %v3839_v35 }
 0x252   : > { %v3880_v48 = vcombine.low %v3872_v15, %v3879_v0  ;;  %v3896_v49 = vrot.slane %v3882_v42, %v5913_v19  ;;  %v3899_v39 = vcombine.low %v3843_v36, %v3847_v12 }
 0x253   : > { %v3906_v40 = vrot.slane %v3898_v47, %v5913_v19  ;;  %v3915_v50 = vcombine.low %v3851_v17, %v3855_v58  ;;  %v3916_v25 = vcombine.low %v3859_v43, %v3863_v44 }
 0x254   : > { %v3897_v32 = vcombine.low %v3889_v13, %v3896_v49  ;;  %5323 = vst.msk [vmem:[%s6155_s25 + $0xa0] sm:$0xff] %vm941_vm0, %v3880_v48  ;;  %v3913_v51 = vrot.slane %v3899_v39, %v5913_v19 }
 0x255   : > { %v3923_v46 = vrot.slane %v3915_v50, %v5913_v19  ;;  %v3930_v52 = vrot.slane %v3916_v25, %v5913_v19 }
 0x256   : > { %5324 = vst.msk [vmem:[%s6155_s25 + $0xa8] sm:$0xff] %vm941_vm0, %v3897_v32  ;;  %v3914_v54 = vcombine.low %v3906_v40, %v3913_v51 }
 0x257   : > { %v3931_v55 = vcombine.low %v3923_v46, %v3930_v52 }
 0x258   : > { %5325 = vst.msk [vmem:[%s6155_s25 + $0xb0] sm:$0xff] %vm941_vm0, %v3914_v54 }
 0x259   : > { %5326 = vst.msk [vmem:[%s6155_s25 + $0xb8] sm:$0xff] %vm941_vm0, %v3931_v55 }
 0x2bb   : > { %v4283_v56 = vpop.trf.xlu1 }
 0x2bc   : > { %v4301_v57 = vcombine.high %v4283_v56, %v4283_v56  ;;  %v4308_v59 = vrot.slane %v4283_v56, %v5896_v45 }
 0x2be   : > { %v4315_v60 = vrot.slane %v4301_v57, %v5896_v45  ;;  %v4316_v61 = vcombine.high %v4308_v59, %v4308_v59  ;;  %v4324_v63 = vrot.slane %v4308_v59, %v5896_v45 }
 0x2bf   : > { %v4284_v1 = vpop.trf.xlu1 }
 0x2c0   : > { %v4317_v4 = vcombine.high %v4315_v60, %v4315_v60  ;;  %v4331_v6 = vrot.slane %v4315_v60, %v5896_v45  ;;  %v4338_v7 = vrot.slane %v4316_v61, %v5896_v45  ;;  %v4346_v37 = vcombine.high %v4324_v63, %v4324_v63 }
 0x2c1   : > { %v4402_v8 = vrot.slane %v4324_v63, %v5903_v62  ;;  %v4350_v10 = vcombine.high %v4284_v1, %v4284_v1  ;;  %v4357_v11 = vrot.slane %v4284_v1, %v5896_v45  ;;  %v4882_v26 = vpop.trf.xlu0 }
 0x2c2   : > { %v4345_v16 = vrot.slane %v4317_v4, %v5896_v45  ;;  %v4347_v53 = vcombine.high %v4331_v6, %v4331_v6  ;;  %v4348_v18 = vcombine.high %v4338_v7, %v4338_v7  ;;  %v4406_v21 = vrot.slane %v4338_v7, %v5903_v62 }
 0x2c3   : > { %v4410_v22 = vrot.slane %v4346_v37, %v5903_v62  ;;  %v4418_v5 = vrot.slane %v4331_v6, %v5903_v62  ;;  %v4364_v9 = vrot.slane %v4350_v10, %v5896_v45  ;;  %v4365_v38 = vcombine.high %v4357_v11, %v4357_v11 }
 0x2c4   : > { %v4349_v24 = vcombine.high %v4345_v16, %v4345_v16  ;;  %v4414_v14 = vrot.slane %v4348_v18, %v5903_v62  ;;  %v4422_v20 = vrot.slane %v4345_v16, %v5903_v62  ;;  %v4426_v2 = vrot.slane %v4347_v53, %v5903_v62 }
 0x2c5   : > { %v4463_v27 = vcombine.low %v4402_v8, %v4406_v21  ;;  %v4366_v28 = vcombine.high %v4364_v9, %v4364_v9  ;;  %v4373_v29 = vrot.slane %v4357_v11, %v5896_v45  ;;  %v4380_v30 = vrot.slane %v4364_v9, %v5896_v45  ;;  %v4883_v39 = vpop.trf.xlu0 }
 0x2c6   : > { %v4430_v23 = vrot.slane %v4349_v24, %v5903_v62  ;;  %v4464_v3 = vcombine.low %v4410_v22, %v4414_v14  ;;  %v4480_v31 = vcombine.low %v4418_v5, %v4422_v20  ;;  %v4387_v33 = vrot.slane %v4365_v38, %v5896_v45 }
 0x2c7   : > { %v4471_v41 = vrot.slane %v4463_v27, %v5913_v19  ;;  %v4394_v34 = vrot.slane %v4366_v28, %v5896_v45  ;;  %v4395_v15 = vcombine.high %v4373_v29, %v4373_v29  ;;  %v4396_v35 = vcombine.high %v4380_v30, %v4380_v30 }
 0x2c8   : > { %v4478_v36 = vrot.slane %v4464_v3, %v5913_v19  ;;  %v4481_v12 = vcombine.low %v4426_v2, %v4430_v23  ;;  %v4488_v0 = vrot.slane %v4480_v31, %v5913_v19  ;;  %v4397_v42 = vcombine.high %v4387_v33, %v4387_v33 }
 0x2c9   : > { %v4398_v13 = vcombine.high %v4394_v34, %v4394_v34  ;;  %v4434_v17 = vrot.slane %v4373_v29, %v5903_v62  ;;  %v4438_v58 = vrot.slane %v4387_v33, %v5903_v62  ;;  %v4442_v43 = vrot.slane %v4395_v15, %v5903_v62 }
 0x2ca   : > { %v4479_v44 = vcombine.low %v4471_v41, %v4478_v36  ;;  %v4495_v47 = vrot.slane %v4481_v12, %v5913_v19  ;;  %v4446_v48 = vrot.slane %v4397_v42, %v5903_v62  ;;  %v4450_v49 = vrot.slane %v4380_v30, %v5903_v62 }
 0x2cb   : > { %v4454_v40 = vrot.slane %v4394_v34, %v5903_v62  ;;  %v4458_v50 = vrot.slane %v4396_v35, %v5903_v62  ;;  %v4462_v25 = vrot.slane %v4398_v13, %v5903_v62  ;;  %v4497_v32 = vcombine.low %v4434_v17, %v4438_v58 }
 0x2cc   : > { %v4496_v51 = vcombine.low %v4488_v0, %v4495_v47  ;;  %5335 = vst.msk [vmem:[%s6155_s25 + $0xc0] sm:$0xff] %vm941_vm0, %v4479_v44  ;;  %v4498_v46 = vcombine.low %v4442_v43, %v4446_v48  ;;  %v4900_v52 = vcombine.high %v4882_v26, %v4882_v26  ;;  %v4907_v54 = vrot.slane %v4882_v26, %v5896_v45 }
 0x2cd   : > { %v4505_v55 = vrot.slane %v4497_v32, %v5913_v19  ;;  %v4514_v56 = vcombine.low %v4450_v49, %v4454_v40  ;;  %v4515_v57 = vcombine.low %v4458_v50, %v4462_v25  ;;  %v4949_v59 = vcombine.high %v4883_v39, %v4883_v39 }
 0x2ce   : > { %5336 = vst.msk [vmem:[%s6155_s25 + $0xc8] sm:$0xff] %vm941_vm0, %v4496_v51  ;;  %v4512_v60 = vrot.slane %v4498_v46, %v5913_v19  ;;  %v4914_v61 = vrot.slane %v4900_v52, %v5896_v45  ;;  %v4915_v63 = vcombine.high %v4907_v54, %v4907_v54  ;;  %v4923_v1 = vrot.slane %v4907_v54, %v5896_v45 }
 0x2cf   : > { %v4522_v4 = vrot.slane %v4514_v56, %v5913_v19  ;;  %v4529_v6 = vrot.slane %v4515_v57, %v5913_v19  ;;  %v4956_v7 = vrot.slane %v4883_v39, %v5896_v45  ;;  %v4963_v37 = vrot.slane %v4949_v59, %v5896_v45 }
 0x2d0   : > { %v4513_v8 = vcombine.low %v4505_v55, %v4512_v60  ;;  %v4916_v10 = vcombine.high %v4914_v61, %v4914_v61  ;;  %v4930_v11 = vrot.slane %v4914_v61, %v5896_v45  ;;  %v4937_v16 = vrot.slane %v4915_v63, %v5896_v45 }
 0x2d1   : > { %v4530_v53 = vcombine.low %v4522_v4, %v4529_v6  ;;  %v4945_v18 = vcombine.high %v4923_v1, %v4923_v1  ;;  %v5001_v21 = vrot.slane %v4923_v1, %v5903_v62  ;;  %v4964_v22 = vcombine.high %v4956_v7, %v4956_v7 }
 0x2d2   : > { %5337 = vst.msk [vmem:[%s6155_s25 + $0xd0] sm:$0xff] %vm941_vm0, %v4513_v8  ;;  %v4944_v5 = vrot.slane %v4916_v10, %v5896_v45  ;;  %v4946_v9 = vcombine.high %v4930_v11, %v4930_v11  ;;  %v4947_v38 = vcombine.high %v4937_v16, %v4937_v16  ;;  %v5005_v24 = vrot.slane %v4937_v16, %v5903_v62 }
 0x2d3   : > { %5338 = vst.msk [vmem:[%s6155_s25 + $0xd8] sm:$0xff] %vm941_vm0, %v4530_v53  ;;  %v5009_v14 = vrot.slane %v4945_v18, %v5903_v62  ;;  %v5017_v20 = vrot.slane %v4930_v11, %v5903_v62  ;;  %v4965_v2 = vcombine.high %v4963_v37, %v4963_v37  ;;  %v4972_v26 = vrot.slane %v4956_v7, %v5896_v45 }
 0x2d4   : > { %v4948_v27 = vcombine.high %v4944_v5, %v4944_v5  ;;  %v5013_v28 = vrot.slane %v4947_v38, %v5903_v62  ;;  %v5021_v29 = vrot.slane %v4944_v5, %v5903_v62  ;;  %v5025_v30 = vrot.slane %v4946_v9, %v5903_v62 }
 0x2d5   : > { %v5062_v23 = vcombine.low %v5001_v21, %v5005_v24  ;;  %v4979_v3 = vrot.slane %v4963_v37, %v5896_v45  ;;  %v4986_v31 = vrot.slane %v4964_v22, %v5896_v45  ;;  %v4993_v33 = vrot.slane %v4965_v2, %v5896_v45 }
 0x2d6   : > { %v5029_v41 = vrot.slane %v4948_v27, %v5903_v62  ;;  %v5063_v34 = vcombine.low %v5009_v14, %v5013_v28  ;;  %v5079_v15 = vcombine.low %v5017_v20, %v5021_v29  ;;  %v4994_v35 = vcombine.high %v4972_v26, %v4972_v26 }
 0x2d7   : > { %v4995_v36 = vcombine.high %v4979_v3, %v4979_v3  ;;  %v4996_v12 = vcombine.high %v4986_v31, %v4986_v31  ;;  %v4997_v0 = vcombine.high %v4993_v33, %v4993_v33  ;;  %v5070_v42 = vrot.slane %v5062_v23, %v5913_v19 }
 0x2d8   : > { %v5077_v13 = vrot.slane %v5063_v34, %v5913_v19  ;;  %v5080_v17 = vcombine.low %v5025_v30, %v5029_v41  ;;  %v5087_v58 = vrot.slane %v5079_v15, %v5913_v19  ;;  %v5033_v43 = vrot.slane %v4972_v26, %v5903_v62 }
 0x2d9   : > { %v5037_v45 = vrot.slane %v4986_v31, %v5903_v62  ;;  %v5041_v44 = vrot.slane %v4994_v35, %v5903_v62  ;;  %v5045_v47 = vrot.slane %v4996_v12, %v5903_v62  ;;  %v5049_v39 = vrot.slane %v4979_v3, %v5903_v62 }
 0x2da   : > { %v5078_v48 = vcombine.low %v5070_v42, %v5077_v13  ;;  %v5094_v49 = vrot.slane %v5080_v17, %v5913_v19  ;;  %v5053_v40 = vrot.slane %v4993_v33, %v5903_v62  ;;  %v5057_v50 = vrot.slane %v4995_v36, %v5903_v62 }
 0x2db   : > { %v5061_v25 = vrot.slane %v4997_v0, %v5903_v62  ;;  %v5096_v32 = vcombine.low %v5033_v43, %v5037_v45  ;;  %v5097_v51 = vcombine.low %v5041_v44, %v5045_v47 }
 0x2dc   : > { %v5095_v46 = vcombine.low %v5087_v58, %v5094_v49  ;;  %5347 = vst.msk [vmem:[%s6155_s25 + $0xe0] sm:$0xff] %vm941_vm0, %v5078_v48  ;;  %v5113_v52 = vcombine.low %v5049_v39, %v5053_v40 }
 0x2dd   : > { %v5104_v54 = vrot.slane %v5096_v32, %v5913_v19  ;;  %v5111_v55 = vrot.slane %v5097_v51, %v5913_v19  ;;  %v5114_v56 = vcombine.low %v5057_v50, %v5061_v25 }
 0x2de   : > { %5348 = vst.msk [vmem:[%s6155_s25 + $0xe8] sm:$0xff] %vm941_vm0, %v5095_v46  ;;  %v5121_v57 = vrot.slane %v5113_v52, %v5913_v19 }
 0x2df   : > { %v5112_v62 = vcombine.low %v5104_v54, %v5111_v55  ;;  %v5128_v59 = vrot.slane %v5114_v56, %v5913_v19 }
 0x2e1   : > { %v5129_v60 = vcombine.low %v5121_v57, %v5128_v59  ;;  %5349 = vst.msk [vmem:[%s6155_s25 + $0xf0] sm:$0xff] %vm941_vm0, %v5112_v62 }
 0x2e3   : > { %5350 = vst.msk [vmem:[%s6155_s25 + $0xf8] sm:$0xff] %vm941_vm0, %v5129_v60 }
 0x2e4   : > { %5471 = shalt.err (!%p5468_p6)
}
 0x2e5   : > { %s5472_s22 = scalar_lea.hbm %s6574_s11, 4096  ;;  %s5476_s26 = scalar_lea.hbm %s6632_s4, 8192 }
 0x2e6   : > { %p5473_p7 = scmp.ne.s32.totalorder %s6574_s11, %s5472_s22  ;;  %p5477_p13 = scmp.lt.s32.totalorder %s6574_s11, %s6632_s4 }
 0x2e7   : > { %p5478_p2 = scmp.lt.s32.totalorder %s5476_s26, %s5472_s22 }
 0x2e8   : > { %p5474_p10 = pnand %p5473_p7, %p5625_p9 }
 0x2e9   : > { %p5479_p8 = por %p5478_p2, %p5477_p13 }
 0x2ea   : > { %p5475_p4 = pneg %p5474_p10 }
 0x2ec   : > { %p5480_p12 = pnand %p5479_p8, %p5475_p4 }
 0x2ee   : > { %5483 = shalt.err (!%p5480_p12)
}
 0x2ef   : > { %s5547_s5 = smov 128   ;;  %s5548_s8 = smov 8  }
 0x2f0   : > { %5360 = dma.vmem_to_hbm [thread:$0]  (%p5625_p9), %s6576_s7, 4096, %s6574_s11, %s5140_s18, %s5547_s5, %s5547_s5, %s5548_s8  }
 0x2f1 PF: > { %s5170_s10 = sand.u32 1, %s5518_s15   ;;  %p6638_p0 = scmp.ge.s32.totalorder %s5538_s20, 2 }
 0x2f2   : > { %s5171_s12 = scalar_lea.sflag [#allocation4], %s5170_s10 }
 0x2f3   : > { %p5367_p1 = pnand %p6638_p0, %p5632_p11 }
 0x2f5   : > { %p5368_p3 = pneg %p5367_p1 }
 0x2f7   : > { %5513 = dma.done.wait (%p5368_p3), %s5171_s12, 4096  }
 0x2f8   : > { %5515 = vsyncadd (%p5368_p3), %s5171_s12, 4294963200  ;;  %s20_s20 = sadd.s32 1, %s5538_s20   ;;  %s6639_s15 = smov %s5522_s16 }
 0x2f9   : > { %p17_p5 = scmp.ge.s32.totalorder %s20_s20, 4   ;;  %s6640_s16 = smov %s5526_s17 }
 0x2fa   : > { %s6641_s17 = smov %s5630_s29  ;;  %s6642_s18 = smov %s5534_s19 }
 0x2fb   : > { %s6643_s19 = smov %s6645_s23  ;;  %19 = sbr.rel (!%p17_p5) target bundleno = 6 (0x6), region = 119 }
 0x300   :  { %5176 = vsyncpa [#allocation3], 1 }
 0x301   :  { %5178 = vsyncpa [#allocation3 + $0x1], 1 }
 0x302   :  { %5179 = vsyncpa [#allocation4], 1 }
 0x303   :  { %5181 = vsyncpa [#allocation4 + $0x1], 1 }

</bundles_post_ra>
